<compile_context>
chip_gen: v7x
topology: tpu7x:2x2x1
jax: 0.10.0
libtpu: 0.0.40
codegen_flags: <defaults>
</compile_context>

<pallas_src>
import jax
import jax.numpy as jnp
from jax.experimental import pallas as pl
from jax.experimental.pallas import tpu as pltpu


def _conv1x1_hswish_pad_kernel(x_ref, wb_ref, o_ref):
    # x_ref:  (C_in, H, W)            one batch element (contiguous NCHW slice)
    # wb_ref: (C_in + 1, C_out, 1, 1) rows 0..C_in-1 = weight columns, row C_in = bias
    # o_ref:  (C_out, Hp, Wp)         padded output, Hp = H + 2, Wp = W + 2
    c_in, h, w = x_ref.shape
    c_out, hp, wp = o_ref.shape

    def act(t):
        # t * clamp(t/8 + 3, 0, 6) / 6, with divisions folded into const muls.
        return t * jnp.minimum(jnp.maximum(t * 0.125 + 3.0, 0.0), 6.0) * (1.0 / 6.0)

    bias = wb_ref[c_in]  # (C_out, 1, 1)

    # Border of a 1x1 conv with zero padding=1 is exactly the bias, so the
    # activated border is a per-channel constant.  Fill the whole block with
    # it, then overwrite the interior (both stores are VMEM-side; writeback is
    # one contiguous tile DMA).
    o_ref[...] = jnp.broadcast_to(act(bias), (c_out, hp, wp)).astype(o_ref.dtype)

    # 1x1 conv as C_in broadcast multiply-accumulates on the VPU.
    acc = bias
    for ci in range(c_in):
        acc = acc + wb_ref[ci] * x_ref[ci]  # (C_out,1,1)*(H,W) -> (C_out,H,W)

    o_ref[:, 1:h + 1, 1:w + 1] = act(acc).astype(o_ref.dtype)


def model_forward(x_nchw, weight, bias):
    """x_nchw: (N, 3, H, W); weight: (16, 3, 1, 1); bias: (16,). Returns (N, 16, H+2, W+2)."""
    N, C_in, H, W = x_nchw.shape
    C_out = weight.shape[0]
    # The fused border shortcut is only valid for a 1x1 kernel, stride 1, pad 1.
    assert weight.shape == (C_out, C_in, 1, 1), "wrapper assumes a 1x1 conv kernel"
    Hp, Wp = H + 2, W + 2

    # Merge weights and bias into one operand: (C_in + 1, C_out, 1, 1).
    w_cols = weight.reshape(C_out, C_in).T                      # (C_in, C_out), w_cols[ci, co]
    wb = jnp.concatenate([w_cols, bias.reshape(1, C_out)], axis=0)
    wb = wb.reshape(C_in + 1, C_out, 1, 1).astype(jnp.float32)

    x_f32 = x_nchw.astype(jnp.float32)

    return pl.pallas_call(
        _conv1x1_hswish_pad_kernel,
        out_shape=jax.ShapeDtypeStruct((N, C_out, Hp, Wp), jnp.float32),
        grid=(N,),
        in_specs=[
            # Batch dim squeezed: kernel sees a contiguous (C_in, H, W) slice.
            pl.BlockSpec((None, C_in, H, W), lambda n: (n, 0, 0, 0)),
            pl.BlockSpec((C_in + 1, C_out, 1, 1), lambda n: (0, 0, 0, 0)),
        ],
        out_specs=pl.BlockSpec((None, C_out, Hp, Wp), lambda n: (n, 0, 0, 0)),
        compiler_params=pltpu.CompilerParams(
            dimension_semantics=("parallel",)),
    )(x_f32, wb)


def _reference(x_nchw, weight, bias):
    # Pure-JAX reference matching the PyTorch module semantics.
    t1 = jax.lax.conv_general_dilated(
        x_nchw, weight, window_strides=(1, 1), padding=((1, 1), (1, 1)),
        dimension_numbers=("NCHW", "OIHW", "NCHW"))
    t1 = t1 + bias.reshape(1, -1, 1, 1)
    t5 = jnp.clip(t1 / 8.0 + 3.0, 0.0, 6.0)
    return t1 * t5 / 6.0


if __name__ == "__main__":
    key = jax.random.PRNGKey(0)
    kx, kw, kb = jax.random.split(key, 3)

    # Small shapes consistent with the module (Conv2d(3, 16, 1)); batch=2 to
    # exercise the batch grid axis.
    x = jax.random.normal(kx, (2, 3, 32, 32), dtype=jnp.float32)
    weight = jax.random.normal(kw, (16, 3, 1, 1), dtype=jnp.float32) * 0.1
    bias = jax.random.normal(kb, (16,), dtype=jnp.float32) * 0.1

    out = jax.block_until_ready(model_forward(x, weight, bias))
    ref = jax.block_until_ready(_reference(x, weight, bias))

    assert out.shape == (2, 16, 34, 34), out.shape
    assert jnp.allclose(out, ref, atol=1e-5, rtol=1e-5)

    print("KERNEL_OK")
</pallas_src>

<mosaic_0001>
module attributes {stable_mosaic.version = 11 : i64} {
  func.func @_conv1x1_hswish_pad_kernel(%arg0: i32, %arg1: memref<1x3x32x32xf32, #tpu.memory_space<vmem>>, %arg2: memref<4x16x1x1xf32, #tpu.memory_space<vmem>>, %arg3: memref<1x16x34x34xf32, #tpu.memory_space<vmem>>) attributes {dimension_semantics = [#tpu.dimension_semantics<parallel>], iteration_bounds = array<i64: 2>, scalar_prefetch = 0 : i64, scratch_operands = 0 : i64, tpu.core_type = #tpu.core_type<tc>, window_params = [{transform_indices = @transform_0, window_bounds = array<i64: 1, 3, 32, 32>}, {pipeline_mode = #tpu.pipeline_mode<synchronous>, transform_indices = @transform_1, window_bounds = array<i64: 4, 16, 1, 1>}, {transform_indices = @transform_2, window_bounds = array<i64: 1, 16, 34, 34>}]} {
    %c3 = arith.constant 3 : index
    %c0 = arith.constant 0 : index
    %c0_0 = arith.constant 0 : index
    %c0_1 = arith.constant 0 : index
    %0 = vector.load %arg2[%c3, %c0, %c0_0, %c0_1] : memref<4x16x1x1xf32, #tpu.memory_space<vmem>>, vector<1x16x1x1xf32>
    %1 = vector.shape_cast %0 : vector<1x16x1x1xf32> to vector<16x1x1xf32>
    %cst = arith.constant 1.250000e-01 : f32
    %2 = vector.broadcast %cst : f32 to vector<16x1x1xf32>
    %3 = arith.mulf %1, %2 : vector<16x1x1xf32>
    %cst_2 = arith.constant 3.000000e+00 : f32
    %4 = vector.broadcast %cst_2 : f32 to vector<16x1x1xf32>
    %5 = arith.addf %3, %4 : vector<16x1x1xf32>
    %cst_3 = arith.constant 0.000000e+00 : f32
    %6 = vector.broadcast %cst_3 : f32 to vector<16x1x1xf32>
    %7 = arith.maximumf %5, %6 : vector<16x1x1xf32>
    %cst_4 = arith.constant 6.000000e+00 : f32
    %8 = vector.broadcast %cst_4 : f32 to vector<16x1x1xf32>
    %9 = arith.minimumf %7, %8 : vector<16x1x1xf32>
    %10 = arith.mulf %1, %9 : vector<16x1x1xf32>
    %cst_5 = arith.constant 0.166666672 : f32
    %11 = vector.broadcast %cst_5 : f32 to vector<16x1x1xf32>
    %12 = arith.mulf %10, %11 : vector<16x1x1xf32>
    %13 = vector.shape_cast %12 : vector<16x1x1xf32> to vector<16x1x1xf32>
    %14 = vector.broadcast %13 : vector<16x1x1xf32> to vector<16x34x34xf32>
    %c0_6 = arith.constant 0 : index
    %c0_7 = arith.constant 0 : index
    %c0_8 = arith.constant 0 : index
    %c0_9 = arith.constant 0 : index
    %15 = vector.load %arg3[%c0_6, %c0_7, %c0_8, %c0_9] : memref<1x16x34x34xf32, #tpu.memory_space<vmem>>, vector<1x16x34x34xf32>
    %16 = vector.shape_cast %15 : vector<1x16x34x34xf32> to vector<16x34x34xf32>
    %17 = vector.shape_cast %14 : vector<16x34x34xf32> to vector<1x16x34x34xf32>
    tpu.vector_store %arg3[%c0_6, %c0_7, %c0_8, %c0_9], %17 {strides = array<i32>} : memref<1x16x34x34xf32, #tpu.memory_space<vmem>>, vector<1x16x34x34xf32>,
    %c0_10 = arith.constant 0 : index
    %c0_11 = arith.constant 0 : index
    %c0_12 = arith.constant 0 : index
    %c0_13 = arith.constant 0 : index
    %18 = vector.load %arg2[%c0_10, %c0_11, %c0_12, %c0_13] : memref<4x16x1x1xf32, #tpu.memory_space<vmem>>, vector<1x16x1x1xf32>
    %19 = vector.shape_cast %18 : vector<1x16x1x1xf32> to vector<16x1x1xf32>
    %c0_14 = arith.constant 0 : index
    %c0_15 = arith.constant 0 : index
    %c0_16 = arith.constant 0 : index
    %c0_17 = arith.constant 0 : index
    %20 = vector.load %arg1[%c0_14, %c0_15, %c0_16, %c0_17] : memref<1x3x32x32xf32, #tpu.memory_space<vmem>>, vector<1x1x32x32xf32>
    %21 = vector.shape_cast %20 : vector<1x1x32x32xf32> to vector<32x32xf32>
    %22 = vector.shape_cast %21 : vector<32x32xf32> to vector<1x32x32xf32>
    %23 = vector.broadcast %19 : vector<16x1x1xf32> to vector<16x32x32xf32>
    %24 = vector.broadcast %22 : vector<1x32x32xf32> to vector<16x32x32xf32>
    %25 = arith.mulf %23, %24 : vector<16x32x32xf32>
    %26 = vector.broadcast %1 : vector<16x1x1xf32> to vector<16x32x32xf32>
    %27 = arith.addf %26, %25 : vector<16x32x32xf32>
    %c1 = arith.constant 1 : index
    %c0_18 = arith.constant 0 : index
    %c0_19 = arith.constant 0 : index
    %c0_20 = arith.constant 0 : index
    %28 = vector.load %arg2[%c1, %c0_18, %c0_19, %c0_20] : memref<4x16x1x1xf32, #tpu.memory_space<vmem>>, vector<1x16x1x1xf32>
    %29 = vector.shape_cast %28 : vector<1x16x1x1xf32> to vector<16x1x1xf32>
    %c0_21 = arith.constant 0 : index
    %c1_22 = arith.constant 1 : index
    %c0_23 = arith.constant 0 : index
    %c0_24 = arith.constant 0 : index
    %30 = vector.load %arg1[%c0_21, %c1_22, %c0_23, %c0_24] : memref<1x3x32x32xf32, #tpu.memory_space<vmem>>, vector<1x1x32x32xf32>
    %31 = vector.shape_cast %30 : vector<1x1x32x32xf32> to vector<32x32xf32>
    %32 = vector.shape_cast %31 : vector<32x32xf32> to vector<1x32x32xf32>
    %33 = vector.broadcast %29 : vector<16x1x1xf32> to vector<16x32x32xf32>
    %34 = vector.broadcast %32 : vector<1x32x32xf32> to vector<16x32x32xf32>
    %35 = arith.mulf %33, %34 : vector<16x32x32xf32>
    %36 = arith.addf %27, %35 : vector<16x32x32xf32>
    %c2 = arith.constant 2 : index
    %c0_25 = arith.constant 0 : index
    %c0_26 = arith.constant 0 : index
    %c0_27 = arith.constant 0 : index
    %37 = vector.load %arg2[%c2, %c0_25, %c0_26, %c0_27] : memref<4x16x1x1xf32, #tpu.memory_space<vmem>>, vector<1x16x1x1xf32>
    %38 = vector.shape_cast %37 : vector<1x16x1x1xf32> to vector<16x1x1xf32>
    %c0_28 = arith.constant 0 : index
    %c2_29 = arith.constant 2 : index
    %c0_30 = arith.constant 0 : index
    %c0_31 = arith.constant 0 : index
    %39 = vector.load %arg1[%c0_28, %c2_29, %c0_30, %c0_31] : memref<1x3x32x32xf32, #tpu.memory_space<vmem>>, vector<1x1x32x32xf32>
    %40 = vector.shape_cast %39 : vector<1x1x32x32xf32> to vector<32x32xf32>
    %41 = vector.shape_cast %40 : vector<32x32xf32> to vector<1x32x32xf32>
    %42 = vector.broadcast %38 : vector<16x1x1xf32> to vector<16x32x32xf32>
    %43 = vector.broadcast %41 : vector<1x32x32xf32> to vector<16x32x32xf32>
    %44 = arith.mulf %42, %43 : vector<16x32x32xf32>
    %45 = arith.addf %36, %44 : vector<16x32x32xf32>
    %cst_32 = arith.constant 1.250000e-01 : f32
    %46 = vector.broadcast %cst_32 : f32 to vector<16x32x32xf32>
    %47 = arith.mulf %45, %46 : vector<16x32x32xf32>
    %cst_33 = arith.constant 3.000000e+00 : f32
    %48 = vector.broadcast %cst_33 : f32 to vector<16x32x32xf32>
    %49 = arith.addf %47, %48 : vector<16x32x32xf32>
    %cst_34 = arith.constant 0.000000e+00 : f32
    %50 = vector.broadcast %cst_34 : f32 to vector<16x32x32xf32>
    %51 = arith.maximumf %49, %50 : vector<16x32x32xf32>
    %cst_35 = arith.constant 6.000000e+00 : f32
    %52 = vector.broadcast %cst_35 : f32 to vector<16x32x32xf32>
    %53 = arith.minimumf %51, %52 : vector<16x32x32xf32>
    %54 = arith.mulf %45, %53 : vector<16x32x32xf32>
    %cst_36 = arith.constant 0.166666672 : f32
    %55 = vector.broadcast %cst_36 : f32 to vector<16x32x32xf32>
    %56 = arith.mulf %54, %55 : vector<16x32x32xf32>
    %c0_37 = arith.constant 0 : index
    %c0_38 = arith.constant 0 : index
    %c1_39 = arith.constant 1 : index
    %c1_40 = arith.constant 1 : index
    %57 = vector.load %arg3[%c0_37, %c0_38, %c1_39, %c1_40] : memref<1x16x34x34xf32, #tpu.memory_space<vmem>>, vector<1x16x32x32xf32>
    %58 = vector.shape_cast %57 : vector<1x16x32x32xf32> to vector<16x32x32xf32>
    %59 = vector.shape_cast %56 : vector<16x32x32xf32> to vector<1x16x32x32xf32>
    tpu.vector_store %arg3[%c0_37, %c0_38, %c1_39, %c1_40], %59 {strides = array<i32>} : memref<1x16x34x34xf32, #tpu.memory_space<vmem>>, vector<1x16x32x32xf32>,
    return
  }
  func.func @transform_0(%arg0: i32) -> (i32, i32, i32, i32) {
    %c0_i32 = arith.constant 0 : i32
    %c0_i32_0 = arith.constant 0 : i32
    %c0_i32_1 = arith.constant 0 : i32
    %c0_i32_2 = arith.constant 0 : i32
    return %arg0, %c0_i32, %c0_i32_0, %c0_i32_1 : i32, i32, i32, i32
  }
  func.func @transform_1(%arg0: i32) -> (i32, i32, i32, i32) {
    %c0_i32 = arith.constant 0 : i32
    %c0_i32_0 = arith.constant 0 : i32
    %c0_i32_1 = arith.constant 0 : i32
    %c0_i32_2 = arith.constant 0 : i32
    %c0_i32_3 = arith.constant 0 : i32
    return %c0_i32, %c0_i32_0, %c0_i32_1, %c0_i32_2 : i32, i32, i32, i32
  }
  func.func @transform_2(%arg0: i32) -> (i32, i32, i32, i32) {
    %c0_i32 = arith.constant 0 : i32
    %c0_i32_0 = arith.constant 0 : i32
    %c0_i32_1 = arith.constant 0 : i32
    %c0_i32_2 = arith.constant 0 : i32
    return %arg0, %c0_i32, %c0_i32_0, %c0_i32_1 : i32, i32, i32, i32
  }
}

</mosaic_0001>

<bundles_post_ra>
// kernel: tpu_custom_call.1
= control target key start
LH: loop header
LB: loop body
LE: loop exit
PB: predicated region body
PF: predicated region fallthrough
CT: control target
= control target key end

     0   :  { %7 = vsyncpa [#allocation3], 0  ;;  %s4344_s0 = inlined_call_operand.hbm [shape: f32[2,3,32,32], index: 0, kind: input, shape index: {}]   ;;  %s4345_s1 = inlined_call_operand.vmem [shape: f32[4,16,1,1], index: 1, kind: input, shape index: {}]   ;;  %s4346_s2 = inlined_call_operand.vmem [shape: f32[2,16,34,34], index: 2, kind: output, shape index: {}]  }
   0x1   :  { %9 = vsyncpa [#allocation3 + $0x1], 0  ;;  %s2546_s9 = smov 0   ;;  %s2548_s10 = smov 0  }
   0x2   :  { %s2550_s11 = smov 0   ;;  %s2552_s12 = smov 0  }
   0x3 LB: > { %s2565_s13 = sadd.s32 4294967295, %s2524_s12   ;;  %s2568_s14 = sadd.s32 1, %s2524_s12   ;;  %s2524_s12 = sphi %s2552_s12, %s4615_s12   ;;  %s2520_s11 = sphi %s2550_s11, %s4614_s11   ;;  %s2516_s10 = sphi %s2548_s10, %s4613_s10   ;;  %s2512_s9 = sphi %s2546_s9, %s4612_s9  }
   0x4   : > { %s19_s15 = ssub.s32 %s2524_s12, %s2568_s14  ;;  %s22_s16 = sadd.s32 1, %s2520_s11 }
   0x5   : > { %p20_p0 = scmp.eq.s32.totalorder %s19_s15, 0  ;;  %p29_p1 = scmp.ne.s32.totalorder %s2520_s11, %s2516_s10 }
   0x6   : > { %p30_p2 = scmp.eq.s32.totalorder %s2524_s12, 0  ;;  %p35_p3 = scmp.ne.s32.totalorder %s2516_s10, %s2512_s9 }
   0x7   : > { %s2578_s17 = scalar_select %p20_p0, %s2520_s11, %s22_s16  }
   0x8   : > { %p31_p4 = por %p30_p2, %p29_p1  ;;  %p36_p5 = scmp.eq.s32.totalorder %s2565_s13, 0 }
   0x9   : > { %p2421_p6 = scmp.lt.s32.totalorder %s2524_s12, 2  ;;  %s109_s19 = sand.u32 1, %s2520_s11  }
   0xa   : > { %p2582_p7 = por %p36_p5, %p35_p3  ;;  %s2411_s20 = smul.u32 96, %s109_s19 }
   0xb   : > { %s2412_s21 = smul.u32 1536, %s2524_s12  ;;  %p2588_p8 = pnand %p2421_p6, %p31_p4 }
   0xc   : > { %s113_s26 = scalar_lea.vmem [#allocation2], %s2411_s20  ;;  %s2600_s28 = scalar_lea.sflag [#allocation3], %s109_s19 }
   0xd   : > { %s2595_s25 = scalar_lea.hbm %s4344_s0, %s2412_s21  ;;  %s120_s27 = sshll.u32 %s113_s26, 4  ;;  %s2597_s27 = int_to_ptr.vmem [resolvable:$true] %s120_s27 }
   0xe   : > { %s2460_s29 = scalar_lea.hbm %s2595_s25, 1536  ;;  %p2462_p11 = pneg %p2588_p8 }
   0xf   : > { %p2461_p10 = scmp.ne.s32.totalorder %s2595_s25, %s2460_s29  ;;  %s2465_s4 = scalar_lea.hbm %s4344_s0, 3072 }
  0x10   : > { %p2466_p0 = scmp.lt.u32.totalorder %s2595_s25, %s4344_s0  ;;  %p2467_p1 = scmp.lt.u32.totalorder %s2465_s4, %s2460_s29 }
  0x11   : > { %p2463_p12 = pnand %p2462_p11, %p2461_p10  ;;  %p2469_p3 = scmp.lt.u32.totalorder %s2460_s29, %s2595_s25 }
  0x12   : > { %p2468_p2 = por %p2467_p1, %p2466_p0 }
  0x13   : > { %p2464_p13 = pneg %p2463_p12 }
  0x14   : > { %p2470_p4 = por %p2469_p3, %p2468_p2 }
  0x16   : > { %p2471_p5 = pnand %p2470_p4, %p2464_p13 }
  0x18   : > { %2474 = shalt.err (!%p2471_p5)
}
  0x19   : > { %s2475_s7 = scalar_lea.vmem %s2597_s27, 1536  ;;  %s2526_s8 = smov [#allocation2]  }
  0x1a   : > { %p2476_p6 = scmp.ne.s32.totalorder %s2597_s27, %s2475_s7  ;;  %s2480_s9 = sshll.u32 %s2526_s8, 4  ;;  %s2481_s9 = int_to_ptr.vmem [resolvable:$false] %s2480_s9 }
  0x1b   : > { %s2482_s15 = scalar_lea.vmem %s2481_s9, 3072  ;;  %p2483_p9 = scmp.lt.s32.totalorder %s2597_s27, %s2481_s9 }
  0x1c   : > { %p2478_p10 = pnand %p2476_p6, %p2462_p11  ;;  %p2484_p0 = scmp.lt.s32.totalorder %s2482_s15, %s2475_s7 }
  0x1e   : > { %p2479_p12 = pneg %p2478_p10  ;;  %p2485_p1 = por %p2484_p0, %p2483_p9 }
  0x20   : > { %p2486_p2 = pnand %p2485_p1, %p2479_p12 }
  0x22   : > { %2489 = shalt.err (!%p2486_p2)
}
  0x23   : > { %s2527_s16 = smov 128   ;;  %s2528_s19 = smov 8  }
  0x24   : > { %2420 = dma.hbm_to_vmem [thread:$0]  (!%p2588_p8), %s2595_s25, 1536, %s2597_s27, %s2600_s28, %s2527_s16, %s2527_s16, %s2528_s19  }
  0x25   : > { %p128_p11 = scmp.lt.s32.totalorder %s2524_s12, 3  ;;  %p4407_p13 = scmp.ge.s32.totalorder %s2524_s12, 1 }
  0x27   : > { %p129_p3 = pnand %p4407_p13, %p128_p11 }
  0x29   : > { %132 = sbr.rel (%p129_p3) target bundleno = 628 (0x274), region = 28 }
  0x30   : > { %s134_s20 = sand.u32 1, %s2516_s10  }
  0x31   : > { %s2413_s21 = smul.u32 96, %s134_s20  ;;  %s135_s23 = scalar_lea.sflag [#allocation3], %s134_s20 }
  0x33   : > { %s2632_s24 = scalar_lea.vmem [#allocation2], %s2413_s21 }
  0x34   : > { %2507 = dma.done.wait (%p2582_p7), %s135_s23, 1536  }
  0x35   : > { %2509 = vsyncadd (%p2582_p7), %s135_s23, 4294965760  ;;  %v293_v0 = vlaneseq  ;;  %v2529_v1 = vmov 0   ;;  %v2643_v4 = vld [vmem:[%s4345_s1 + $0x32] sm:$0x1]  ;;  %v2648_v5 = vld [vmem:[%s4345_s1 + $0x30] sm:$0x1] }
  0x36   : > { %2459 = vset.pattern.permute.xlu1 %v2529_v1  ;;  %2458 = vset.pattern.permute.xlu0 %v2529_v1  ;;  %v2653_v6 = vld [vmem:[%s4345_s1 + $0x33] sm:$0x1]  ;;  %v183_v7 = vmul.f32 0.125, %v2643_v4  ;;  %v181_v8 = vmul.f32 0.125, %v2648_v5  ;;  %v2661_v10 = vld [vmem:[%s4345_s1 + $0x31] sm:$0x1] }
  0x37   : > { %v294_v2 = vshrl.u32 %v293_v0, 7  ;;  %v184_v9 = vmul.f32 0.125, %v2653_v6  ;;  %v182_v12 = vmul.f32 0.125, %v2661_v10  ;;  %v2669_v13 = vld [vmem:[%s4345_s1 + $0x35] sm:$0x1]  ;;  %p159_p7 = scmp.lt.s32.totalorder %s2565_s13, 1 }
  0x38   : > { %v2674_v14 = vld [vmem:[%s4345_s1 + $0x34] sm:$0x1]  ;;  %v199_v18 = vadd.f32 3.0, %v183_v7  ;;  %v197_v19 = vadd.f32 3.0, %v181_v8  ;;  %v186_v21 = vmul.f32 0.125, %v2669_v13  ;;  %vm421_vm0 = vcmask 277504  }
  0x39   : > { %v2638_v3 = vsub.s32 0, %v294_v2  ;;  %v200_v20 = vadd.f32 3.0, %v184_v9  ;;  %v2686_v22 = vld [vmem:[%s4345_s1 + $0x37] sm:$0x1]  ;;  %v198_v23 = vadd.f32 3.0, %v182_v12  ;;  %v185_v24 = vmul.f32 0.125, %v2674_v14 }
  0x3a   : > { %v188_v25 = vmul.f32 0.125, %v2686_v22  ;;  %v2693_v26 = vld [vmem:[%s4345_s1 + $0x36] sm:$0x1]  ;;  %v215_v28 = vmax.f32 %v199_v18, 0.0  ;;  %v213_v29 = vmax.f32 %v197_v19, 0.0  ;;  %v202_v31 = vadd.f32 3.0, %v186_v21 }
  0x3b   : > { %v750_v11 = vrot.slane %v2648_v5, %v2638_v3  ;;  %v754_v15 = vrot.slane %v2661_v10, %v2638_v3  ;;  %v762_v16 = vrot.slane %v2653_v6, %v2638_v3  ;;  %v758_v17 = vrot.slane %v2643_v4, %v2638_v3  ;;  %v2705_v52 = vld [vmem:[%s4345_s1 + $0x39] sm:$0x1]  ;;  %v2710_v53 = vld [vmem:[%s4345_s1 + $0x38] sm:$0x1]  ;;  %v2718_v62 = vld [vmem:[%s4345_s1 + $0x3b] sm:$0x1] }
  0x3c   : > { %v770_v27 = vrot.slane %v2669_v13, %v2638_v3  ;;  %v216_v30 = vmax.f32 %v200_v20, 0.0  ;;  %v214_v32 = vmax.f32 %v198_v23, 0.0  ;;  %v201_v33 = vadd.f32 3.0, %v185_v24  ;;  %v2726_v7 = vld [vmem:[%s4345_s1 + $0x3a] sm:$0x1]  ;;  %s4617_s13 = smov (!%p159_p7, %s2565_s13), 1 }
  0x3d   : > { %v204_v34 = vadd.f32 3.0, %v188_v25  ;;  %v187_v35 = vmul.f32 0.125, %v2693_v26  ;;  %v231_v36 = vmin.f32 %v215_v28, 6.0  ;;  %v229_v37 = vmin.f32 %v213_v29, 6.0  ;;  %v2731_v8 = vld [vmem:[%s4345_s1 + $0x3d] sm:$0x1] }
  0x3e   : > { %v232_v38 = vmin.f32 %v216_v30, 6.0  ;;  %v218_v39 = vmax.f32 %v202_v31, 0.0  ;;  %v230_v40 = vmin.f32 %v214_v32, 6.0  ;;  %v217_v41 = vmax.f32 %v201_v33, 0.0  ;;  %v2738_v20 = vld [vmem:[%s4345_s1 + $0x3c] sm:$0x1] }
  0x3f   : > { %v220_v42 = vmax.f32 %v204_v34, 0.0  ;;  %v203_v43 = vadd.f32 3.0, %v187_v35  ;;  %v247_v44 = vmul.f32 %v2643_v4, %v231_v36  ;;  %v245_v45 = vmul.f32 %v2648_v5, %v229_v37  ;;  %v2747_v28 = vld [vmem:[%s4345_s1 + $0x3f] sm:$0x1]  ;;  %v2756_v37 = vld [vmem:[%s4345_s1 + $0x3e] sm:$0x1] }
  0x40   : > { %v248_v46 = vmul.f32 %v2653_v6, %v232_v38  ;;  %v234_v47 = vmin.f32 %v218_v39, 6.0  ;;  %v246_v48 = vmul.f32 %v2661_v10, %v230_v40  ;;  %v233_v49 = vmin.f32 %v217_v41, 6.0  ;;  %v2358_v4 = vld [vmem:[%s4345_s1 + $0x11] ss:$0 sm:$0xff]  ;;  %v2357_v5 = vld [vmem:[%s4345_s1 + $0x10] ss:$0 sm:$0xff] }
  0x41   : > { %v236_v50 = vmin.f32 %v220_v42, 6.0  ;;  %v219_v51 = vmax.f32 %v203_v43, 0.0  ;;  %v263_v54 = vmul.f32 0.16666667, %v247_v44  ;;  %v261_v55 = vmul.f32 0.16666667, %v245_v45 }
  0x42   : > { %v264_v56 = vmul.f32 0.16666667, %v248_v46  ;;  %v250_v57 = vmul.f32 %v2669_v13, %v234_v47  ;;  %v262_v58 = vmul.f32 0.16666667, %v246_v48  ;;  %v249_v59 = vmul.f32 %v2674_v14, %v233_v49  ;;  %v2359_v6 = vld [vmem:[%s4345_s1 + $0x12] ss:$0 sm:$0xff] }
  0x43   : > { %v252_v60 = vmul.f32 %v2686_v22, %v236_v50  ;;  %v235_v61 = vmin.f32 %v219_v51, 6.0  ;;  %v304_v63 = vrot.slane %v263_v54, %v2638_v3  ;;  %v296_v0 = vrot.slane %v261_v55, %v2638_v3  ;;  %v2362_v10 = vld [vmem:[%s4345_s1 + $0x15] ss:$0 sm:$0xff]  ;;  %v2364_v13 = vld [vmem:[%s4345_s1 + $0x17] ss:$0 sm:$0xff]  ;;  %s2414_s30 = smul.u32 640, %s4617_s13 }
  0x44   : > { %v308_v1 = vrot.slane %v264_v56, %v2638_v3  ;;  %v266_v2 = vmul.f32 0.16666667, %v250_v57  ;;  %v300_v9 = vrot.slane %v262_v58, %v2638_v3  ;;  %v265_v12 = vmul.f32 0.16666667, %v249_v59 }
  0x45   : > { %v268_v18 = vmul.f32 0.16666667, %v252_v60  ;;  %v251_v19 = vmul.f32 %v2693_v26, %v235_v61  ;;  %366 = vperm.xlu1 %2459, %v304_v63   ;;  %358 = vperm.xlu0 %2458, %v296_v0   ;;  %v190_v23 = vmul.f32 0.125, %v2705_v52  ;;  %v189_v24 = vmul.f32 0.125, %v2710_v53  ;;  %s2925_s5 = scalar_lea.vmem %s4346_s2, %s2414_s30 }
  0x46   : > { %v316_v21 = vrot.slane %v266_v2, %v2638_v3  ;;  %v192_v25 = vmul.f32 0.125, %v2718_v62  ;;  %v312_v29 = vrot.slane %v265_v12, %v2638_v3  ;;  %v191_v32 = vmul.f32 0.125, %v2726_v7 }
  0x47   : > { %v324_v30 = vrot.slane %v268_v18, %v2638_v3  ;;  %v267_v31 = vmul.f32 0.16666667, %v251_v19  ;;  %v206_v33 = vadd.f32 3.0, %v190_v23  ;;  %v205_v34 = vadd.f32 3.0, %v189_v24 }
  0x48   : > { %v208_v35 = vadd.f32 3.0, %v192_v25  ;;  %v194_v36 = vmul.f32 0.125, %v2731_v8  ;;  %v207_v39 = vadd.f32 3.0, %v191_v32  ;;  %v193_v40 = vmul.f32 0.125, %v2738_v20 }
  0x49   : > { %v320_v38 = vrot.slane %v267_v31, %v2638_v3  ;;  %v196_v41 = vmul.f32 0.125, %v2747_v28  ;;  %370 = vperm.xlu1 %2459, %v308_v1   ;;  %362 = vperm.xlu0 %2458, %v300_v9   ;;  %v222_v42 = vmax.f32 %v206_v33, 0.0  ;;  %v221_v43 = vmax.f32 %v205_v34, 0.0 }
  0x4a   : > { %v224_v44 = vmax.f32 %v208_v35, 0.0  ;;  %v210_v45 = vadd.f32 3.0, %v194_v36  ;;  %v223_v46 = vmax.f32 %v207_v39, 0.0  ;;  %v209_v47 = vadd.f32 3.0, %v193_v40 }
  0x4b   : > { %v212_v48 = vadd.f32 3.0, %v196_v41  ;;  %v195_v49 = vmul.f32 0.125, %v2756_v37  ;;  %v238_v50 = vmin.f32 %v222_v42, 6.0  ;;  %v237_v51 = vmin.f32 %v221_v43, 6.0 }
  0x4c   : > { %v240_v54 = vmin.f32 %v224_v44, 6.0  ;;  %v226_v55 = vmax.f32 %v210_v45, 0.0  ;;  %v239_v56 = vmin.f32 %v223_v46, 6.0  ;;  %v225_v57 = vmax.f32 %v209_v47, 0.0 }
  0x4d   : > { %v228_v58 = vmax.f32 %v212_v48, 0.0  ;;  %v211_v59 = vadd.f32 3.0, %v195_v49  ;;  %378 = vperm.xlu1 %2459, %v316_v21   ;;  %374 = vperm.xlu0 %2458, %v312_v29   ;;  %v254_v60 = vmul.f32 %v2705_v52, %v238_v50  ;;  %v253_v61 = vmul.f32 %v2710_v53, %v237_v51  ;;  %v2324_v50 = vld [vmem:[%s4345_s1 + $0x3] ss:$0 sm:$0xff]  ;;  %v2323_v51 = vld [vmem:[%s4345_s1 + $0x2] ss:$0 sm:$0xff] }
  0x4e   : > { %v256_v63 = vmul.f32 %v2718_v62, %v240_v54  ;;  %v242_v0 = vmin.f32 %v226_v55, 6.0  ;;  %v255_v1 = vmul.f32 %v2726_v7, %v239_v56  ;;  %v241_v2 = vmin.f32 %v225_v57, 6.0  ;;  %v2326_v54 = vld [vmem:[%s4345_s1 + $0x5] ss:$0 sm:$0xff]  ;;  %v2325_v55 = vld [vmem:[%s4345_s1 + $0x4] ss:$0 sm:$0xff] }
  0x4f   : > { %v244_v9 = vmin.f32 %v228_v58, 6.0  ;;  %v227_v12 = vmax.f32 %v211_v59, 0.0  ;;  %v270_v18 = vmul.f32 0.16666667, %v254_v60  ;;  %v269_v19 = vmul.f32 0.16666667, %v253_v61 }
  0x50   : > { %v272_v23 = vmul.f32 0.16666667, %v256_v63  ;;  %v271_v24 = vmul.f32 0.16666667, %v255_v1  ;;  %v258_v25 = vmul.f32 %v2731_v8, %v242_v0  ;;  %v257_v32 = vmul.f32 %v2738_v20, %v241_v2  ;;  %v2328_v56 = vld [vmem:[%s4345_s1 + $0x7] ss:$0 sm:$0xff] }
  0x51   : > { %v243_v21 = vmin.f32 %v227_v12, 6.0  ;;  %386 = vperm.xlu1 %2459, %v324_v30   ;;  %382 = vperm.xlu0 %2458, %v320_v38   ;;  %v332_v29 = vrot.slane %v270_v18, %v2638_v3  ;;  %v328_v31 = vrot.slane %v269_v19, %v2638_v3  ;;  %v260_v33 = vmul.f32 %v2747_v28, %v244_v9  ;;  %v2327_v57 = vld [vmem:[%s4345_s1 + $0x6] ss:$0 sm:$0xff]  ;;  %v2330_v58 = vld [vmem:[%s4345_s1 + $0x9] ss:$0 sm:$0xff] }
  0x52   : > { %v340_v34 = vrot.slane %v272_v23, %v2638_v3  ;;  %v766_v35 = vrot.slane %v2674_v14, %v2638_v3  ;;  %v778_v36 = vrot.slane %v2686_v22, %v2638_v3  ;;  %v774_v30 = vrot.slane %v2693_v26, %v2638_v3  ;;  %v2329_v59 = vld [vmem:[%s4345_s1 + $0x8] ss:$0 sm:$0xff]  ;;  %v2332_v60 = vld [vmem:[%s4345_s1 + $0xb] ss:$0 sm:$0xff]  ;;  %v2331_v61 = vld [vmem:[%s4345_s1 + $0xa] ss:$0 sm:$0xff] }
  0x53   : > { %v336_v38 = vrot.slane %v271_v24, %v2638_v3  ;;  %v274_v39 = vmul.f32 0.16666667, %v258_v25  ;;  %v259_v40 = vmul.f32 %v2756_v37, %v243_v21  ;;  %v786_v41 = vrot.slane %v2705_v52, %v2638_v3  ;;  %v2334_v63 = vld [vmem:[%s4345_s1 + $0xd] ss:$0 sm:$0xff]  ;;  %v2333_v0 = vld [vmem:[%s4345_s1 + $0xc] ss:$0 sm:$0xff] }
  0x54   : > { %v273_v42 = vmul.f32 0.16666667, %v257_v32  ;;  %v782_v43 = vrot.slane %v2710_v53, %v2638_v3  ;;  %v794_v44 = vrot.slane %v2718_v62, %v2638_v3  ;;  %v790_v45 = vrot.slane %v2726_v7, %v2638_v3  ;;  %v2336_v1 = vld [vmem:[%s4345_s1 + $0xf] ss:$0 sm:$0xff]  ;;  %v2335_v2 = vld [vmem:[%s4345_s1 + $0xe] ss:$0 sm:$0xff] }
  0x55   : > { %394 = vperm.xlu1 %2459, %v332_v29   ;;  %390 = vperm.xlu0 %2458, %v328_v31   ;;  %v802_v46 = vrot.slane %v2731_v8, %v2638_v3  ;;  %v798_v47 = vrot.slane %v2738_v20, %v2638_v3  ;;  %v810_v52 = vrot.slane %v2747_v28, %v2638_v3  ;;  %v276_v49 = vmul.f32 0.16666667, %v260_v33  ;;  %v2322_v28 = vld [vmem:[%s4345_s1 + $0x1] ss:$0 sm:$0xff]  ;;  %v2363_v14 = vld [vmem:[%s4345_s1 + $0x16] ss:$0 sm:$0xff] }
  0x56   : > { %v806_v48 = vrot.slane %v2756_v37, %v2638_v3  ;;  %v348_v53 = vrot.slane %v274_v39, %v2638_v3  ;;  %v344_v62 = vrot.slane %v273_v42, %v2638_v3  ;;  %v275_v7 = vmul.f32 0.16666667, %v259_v40  ;;  %v2321_v37 = vld [vmem:[%s4345_s1] ss:$0 sm:$0xff]  ;;  %v2367_v22 = vld [vmem:[%s4345_s1 + $0x1a] ss:$0 sm:$0xff] }
  0x57   : > { %v356_v8 = vrot.slane %v276_v49, %v2638_v3  ;;  %v2370_v26 = vld [vmem:[%s4345_s1 + $0x1d] ss:$0 sm:$0xff]  ;;  %v2372_v9 = vld [vmem:[%s4345_s1 + $0x1f] ss:$0 sm:$0xff]  ;;  %v2371_v12 = vld [vmem:[%s4345_s1 + $0x1e] ss:$0 sm:$0xff] }
  0x58   : > { %v352_v20 = vrot.slane %v275_v7, %v2638_v3  ;;  %v2360_v3 = vld [vmem:[%s4345_s1 + $0x13] ss:$0 sm:$0xff]  ;;  %vm426_vm1 = vcmask 271360   ;;  %v2394_v18 = vld [vmem:[%s4345_s1 + $0x21] ss:$0 sm:$0xff]  ;;  %vm2167_vm2 = vcmask 269320  }
  0x59   : > { %402 = vperm.xlu1 %2459, %v340_v34   ;;  %398 = vperm.xlu0 %2458, %v336_v38   ;;  %v2393_v19 = vld [vmem:[%s4345_s1 + $0x20] ss:$0 sm:$0xff]  ;;  %v2396_v25 = vld [vmem:[%s4345_s1 + $0x23] ss:$0 sm:$0xff]  ;;  %v2395_v21 = vld [vmem:[%s4345_s1 + $0x22] ss:$0 sm:$0xff] }
  0x5a   : > { %v2398_v32 = vld [vmem:[%s4345_s1 + $0x25] ss:$0 sm:$0xff]  ;;  %v2397_v33 = vld [vmem:[%s4345_s1 + $0x24] ss:$0 sm:$0xff]  ;;  %v2402_v40 = vld [vmem:[%s4345_s1 + $0x29] ss:$0 sm:$0xff] }
  0x5b   : > { %v2408_v49 = vld [vmem:[%s4345_s1 + $0x2f] ss:$0 sm:$0xff]  ;;  %v2407_v7 = vld [vmem:[%s4345_s1 + $0x2e] ss:$0 sm:$0xff] }
  0x5d   : > { %410 = vperm.xlu1 %2459, %v348_v53   ;;  %406 = vperm.xlu0 %2458, %v344_v62  }
  0x61   : > { %418 = vperm.xlu1 %2459, %v356_v8   ;;  %414 = vperm.xlu0 %2458, %v352_v20  }
  0x65   : > { %608 = vperm.xlu1 %2459, %v2322_v28   ;;  %604 = vperm.xlu0 %2458, %v2321_v37  }
  0x69   : > { %616 = vperm.xlu1 %2459, %v2324_v50   ;;  %612 = vperm.xlu0 %2458, %v2323_v51  }
  0x6d   : > { %624 = vperm.xlu1 %2459, %v2326_v54   ;;  %620 = vperm.xlu0 %2458, %v2325_v55  }
  0x71   : > { %632 = vperm.xlu1 %2459, %v2328_v56   ;;  %628 = vperm.xlu0 %2458, %v2327_v57  }
  0x75   : > { %640 = vperm.xlu1 %2459, %v2330_v58   ;;  %636 = vperm.xlu0 %2458, %v2329_v59  }
  0x79   : > { %648 = vperm.xlu1 %2459, %v2332_v60   ;;  %644 = vperm.xlu0 %2458, %v2331_v61  }
  0x7d   : > { %656 = vperm.xlu1 %2459, %v2334_v63   ;;  %652 = vperm.xlu0 %2458, %v2333_v0  }
  0x81   : > { %664 = vperm.xlu1 %2459, %v2336_v1   ;;  %660 = vperm.xlu0 %2458, %v2335_v2  }
  0x85   : > { %816 = vperm.xlu1 %2459, %v754_v15   ;;  %812 = vperm.xlu0 %2458, %v750_v11   ;;  %v2361_v11 = vld [vmem:[%s4345_s1 + $0x14] ss:$0 sm:$0xff]  ;;  %v2366_v15 = vld [vmem:[%s4345_s1 + $0x19] ss:$0 sm:$0xff] }
  0x89   : > { %824 = vperm.xlu1 %2459, %v762_v16   ;;  %820 = vperm.xlu0 %2458, %v758_v17   ;;  %v2365_v16 = vld [vmem:[%s4345_s1 + $0x18] ss:$0 sm:$0xff]  ;;  %v2368_v17 = vld [vmem:[%s4345_s1 + $0x1b] ss:$0 sm:$0xff] }
  0x8d   : > { %832 = vperm.xlu1 %2459, %v770_v27   ;;  %828 = vperm.xlu0 %2458, %v766_v35   ;;  %v2369_v27 = vld [vmem:[%s4345_s1 + $0x1c] ss:$0 sm:$0xff] }
  0x91   : > { %840 = vperm.xlu1 %2459, %v778_v36   ;;  %836 = vperm.xlu0 %2458, %v774_v30   ;;  %v2400_v36 = vld [vmem:[%s4345_s1 + $0x27] ss:$0 sm:$0xff]  ;;  %v2399_v30 = vld [vmem:[%s4345_s1 + $0x26] ss:$0 sm:$0xff] }
  0x95   : > { %848 = vperm.xlu1 %2459, %v786_v41   ;;  %844 = vperm.xlu0 %2458, %v782_v43   ;;  %v2401_v41 = vld [vmem:[%s4345_s1 + $0x28] ss:$0 sm:$0xff] }
  0x99   : > { %856 = vperm.xlu1 %2459, %v794_v44   ;;  %852 = vperm.xlu0 %2458, %v790_v45   ;;  %v2404_v44 = vld [vmem:[%s4345_s1 + $0x2b] ss:$0 sm:$0xff]  ;;  %v2403_v45 = vld [vmem:[%s4345_s1 + $0x2a] ss:$0 sm:$0xff] }
  0x9d   : > { %864 = vperm.xlu1 %2459, %v802_v46   ;;  %860 = vperm.xlu0 %2458, %v798_v47  }
  0xa1   : > { %872 = vperm.xlu1 %2459, %v810_v52   ;;  %868 = vperm.xlu0 %2458, %v806_v48   ;;  %v2406_v52 = vld [vmem:[%s4345_s1 + $0x2d] ss:$0 sm:$0xff]  ;;  %v2405_v48 = vld [vmem:[%s4345_s1 + $0x2c] ss:$0 sm:$0xff] }
  0xa5   : > { %1046 = vperm.xlu1 %2459, %v2358_v4   ;;  %1042 = vperm.xlu0 %2458, %v2357_v5  }
  0xa9   : > { %1054 = vperm.xlu1 %2459, %v2360_v3   ;;  %1050 = vperm.xlu0 %2458, %v2359_v6  }
  0xad   : > { %1062 = vperm.xlu1 %2459, %v2362_v10   ;;  %1058 = vperm.xlu0 %2458, %v2361_v11  }
  0xb1   : > { %1070 = vperm.xlu1 %2459, %v2364_v13   ;;  %1066 = vperm.xlu0 %2458, %v2363_v14  }
  0xb5   : > { %1078 = vperm.xlu1 %2459, %v2366_v15   ;;  %1074 = vperm.xlu0 %2458, %v2365_v16  }
  0xb9   : > { %1086 = vperm.xlu1 %2459, %v2368_v17   ;;  %1082 = vperm.xlu0 %2458, %v2367_v22   ;;  %v3178_v17 = vld [vmem:[%s2632_s24] sm:$0xff]  ;;  %v3181_v22 = vld [vmem:[%s2632_s24 + $0x8] sm:$0xff] }
  0xba   : > { %4417 = vst [vmem:[#allocation14_spill] sm:$0xff] %v3181_v22 }
  0xbd   : > { %1094 = vperm.xlu1 %2459, %v2370_v26   ;;  %1090 = vperm.xlu0 %2458, %v2369_v27   ;;  %v3184_v26 = vld [vmem:[%s2632_s24 + $0x10] sm:$0xff] }
  0xbe   : > { %4418 = vst [vmem:[#allocation15_spill] sm:$0xff] %v3184_v26 }
  0xc1   : > { %1102 = vperm.xlu1 %2459, %v2372_v9   ;;  %1098 = vperm.xlu0 %2458, %v2371_v12   ;;  %v3191_v12 = vld [vmem:[%s2632_s24 + $0x18] sm:$0xff] }
  0xc4   : > { %v367_v23 = vpop.permute.xlu1 %366  ;;  %v359_v24 = vpop.permute.xlu0 %358 }
  0xc5   : > { %433 = vst.msk [vmem:[%s2925_s5 + $0x50] sm:$0xff] %vm421_vm0, %v367_v23  ;;  %434 = vst.msk [vmem:[%s2925_s5 + $0x58] sm:$0xff] %vm421_vm0, %v367_v23  ;;  %1340 = vperm.xlu1 %2459, %v2394_v18   ;;  %1336 = vperm.xlu0 %2458, %v2393_v19  }
  0xc6   : > { %435 = vst.msk [vmem:[%s2925_s5 + $0x60] sm:$0xff] %vm421_vm0, %v367_v23  ;;  %436 = vst.msk [vmem:[%s2925_s5 + $0x68] sm:$0xff] %vm421_vm0, %v367_v23 }
  0xc7   : > { %437 = vst.msk [vmem:[%s2925_s5 + $0x70] sm:$0x3] %vm426_vm1, %v367_v23  ;;  %427 = vst.msk [vmem:[%s2925_s5 + $0x20] sm:$0x3] %vm426_vm1, %v359_v24 }
  0xc8   : > { %422 = vst.msk [vmem:[%s2925_s5] sm:$0xff] %vm421_vm0, %v359_v24  ;;  %423 = vst.msk [vmem:[%s2925_s5 + $0x8] sm:$0xff] %vm421_vm0, %v359_v24  ;;  %v371_v29 = vpop.permute.xlu1 %370  ;;  %v363_v31 = vpop.permute.xlu0 %362 }
  0xc9   : > { %424 = vst.msk [vmem:[%s2925_s5 + $0x10] sm:$0xff] %vm421_vm0, %v359_v24  ;;  %425 = vst.msk [vmem:[%s2925_s5 + $0x18] sm:$0xff] %vm421_vm0, %v359_v24  ;;  %1348 = vperm.xlu1 %2459, %v2396_v25   ;;  %1344 = vperm.xlu0 %2458, %v2395_v21  }
  0xca   : > { %438 = vst.msk [vmem:[%s2925_s5 + $0x78] sm:$0xff] %vm421_vm0, %v371_v29  ;;  %439 = vst.msk [vmem:[%s2925_s5 + $0x80] sm:$0xff] %vm421_vm0, %v371_v29 }
  0xcb   : > { %440 = vst.msk [vmem:[%s2925_s5 + $0x88] sm:$0xff] %vm421_vm0, %v371_v29  ;;  %441 = vst.msk [vmem:[%s2925_s5 + $0x90] sm:$0xff] %vm421_vm0, %v371_v29 }
  0xcc   : > { %442 = vst.msk [vmem:[%s2925_s5 + $0x98] sm:$0x3] %vm426_vm1, %v371_v29  ;;  %432 = vst.msk [vmem:[%s2925_s5 + $0x48] sm:$0x3] %vm426_vm1, %v363_v31  ;;  %v379_v34 = vpop.permute.xlu1 %378  ;;  %v375_v35 = vpop.permute.xlu0 %374 }
  0xcd   : > { %428 = vst.msk [vmem:[%s2925_s5 + $0x28] sm:$0xff] %vm421_vm0, %v363_v31  ;;  %429 = vst.msk [vmem:[%s2925_s5 + $0x30] sm:$0xff] %vm421_vm0, %v363_v31  ;;  %1356 = vperm.xlu1 %2459, %v2398_v32   ;;  %1352 = vperm.xlu0 %2458, %v2397_v33  }
  0xce   : > { %430 = vst.msk [vmem:[%s2925_s5 + $0x38] sm:$0xff] %vm421_vm0, %v363_v31  ;;  %431 = vst.msk [vmem:[%s2925_s5 + $0x40] sm:$0xff] %vm421_vm0, %v363_v31 }
  0xcf   : > { %448 = vst.msk [vmem:[%s2925_s5 + $0xc8] sm:$0xff] %vm421_vm0, %v379_v34  ;;  %449 = vst.msk [vmem:[%s2925_s5 + $0xd0] sm:$0xff] %vm421_vm0, %v379_v34 }
  0xd0   : > { %450 = vst.msk [vmem:[%s2925_s5 + $0xd8] sm:$0xff] %vm421_vm0, %v379_v34  ;;  %451 = vst.msk [vmem:[%s2925_s5 + $0xe0] sm:$0xff] %vm421_vm0, %v379_v34  ;;  %v387_v38 = vpop.permute.xlu1 %386  ;;  %v383_v39 = vpop.permute.xlu0 %382 }
  0xd1   : > { %452 = vst.msk [vmem:[%s2925_s5 + $0xe8] sm:$0x3] %vm426_vm1, %v379_v34  ;;  %447 = vst.msk [vmem:[%s2925_s5 + $0xc0] sm:$0x3] %vm426_vm1, %v375_v35  ;;  %1364 = vperm.xlu1 %2459, %v2400_v36   ;;  %1360 = vperm.xlu0 %2458, %v2399_v30  }
  0xd2   : > { %443 = vst.msk [vmem:[%s2925_s5 + $0xa0] sm:$0xff] %vm421_vm0, %v375_v35  ;;  %444 = vst.msk [vmem:[%s2925_s5 + $0xa8] sm:$0xff] %vm421_vm0, %v375_v35 }
  0xd3   : > { %445 = vst.msk [vmem:[%s2925_s5 + $0xb0] sm:$0xff] %vm421_vm0, %v375_v35  ;;  %446 = vst.msk [vmem:[%s2925_s5 + $0xb8] sm:$0xff] %vm421_vm0, %v375_v35 }
  0xd4   : > { %458 = vst.msk [vmem:[%s2925_s5 + $0x118] sm:$0xff] %vm421_vm0, %v387_v38  ;;  %459 = vst.msk [vmem:[%s2925_s5 + $0x120] sm:$0xff] %vm421_vm0, %v387_v38  ;;  %v395_v42 = vpop.permute.xlu1 %394  ;;  %v391_v43 = vpop.permute.xlu0 %390 }
  0xd5   : > { %460 = vst.msk [vmem:[%s2925_s5 + $0x128] sm:$0xff] %vm421_vm0, %v387_v38  ;;  %461 = vst.msk [vmem:[%s2925_s5 + $0x130] sm:$0xff] %vm421_vm0, %v387_v38  ;;  %1372 = vperm.xlu1 %2459, %v2402_v40   ;;  %1368 = vperm.xlu0 %2458, %v2401_v41  }
  0xd6   : > { %462 = vst.msk [vmem:[%s2925_s5 + $0x138] sm:$0x3] %vm426_vm1, %v387_v38  ;;  %457 = vst.msk [vmem:[%s2925_s5 + $0x110] sm:$0x3] %vm426_vm1, %v383_v39 }
  0xd7   : > { %453 = vst.msk [vmem:[%s2925_s5 + $0xf0] sm:$0xff] %vm421_vm0, %v383_v39  ;;  %454 = vst.msk [vmem:[%s2925_s5 + $0xf8] sm:$0xff] %vm421_vm0, %v383_v39 }
  0xd8   : > { %455 = vst.msk [vmem:[%s2925_s5 + $0x100] sm:$0xff] %vm421_vm0, %v383_v39  ;;  %456 = vst.msk [vmem:[%s2925_s5 + $0x108] sm:$0xff] %vm421_vm0, %v383_v39  ;;  %v403_v46 = vpop.permute.xlu1 %402  ;;  %v399_v47 = vpop.permute.xlu0 %398 }
  0xd9   : > { %468 = vst.msk [vmem:[%s2925_s5 + $0x168] sm:$0xff] %vm421_vm0, %v395_v42  ;;  %469 = vst.msk [vmem:[%s2925_s5 + $0x170] sm:$0xff] %vm421_vm0, %v395_v42  ;;  %1380 = vperm.xlu1 %2459, %v2404_v44   ;;  %1376 = vperm.xlu0 %2458, %v2403_v45  }
  0xda   : > { %470 = vst.msk [vmem:[%s2925_s5 + $0x178] sm:$0xff] %vm421_vm0, %v395_v42  ;;  %471 = vst.msk [vmem:[%s2925_s5 + $0x180] sm:$0xff] %vm421_vm0, %v395_v42 }
  0xdb   : > { %472 = vst.msk [vmem:[%s2925_s5 + $0x188] sm:$0x3] %vm426_vm1, %v395_v42  ;;  %467 = vst.msk [vmem:[%s2925_s5 + $0x160] sm:$0x3] %vm426_vm1, %v391_v43 }
  0xdc   : > { %463 = vst.msk [vmem:[%s2925_s5 + $0x140] sm:$0xff] %vm421_vm0, %v391_v43  ;;  %464 = vst.msk [vmem:[%s2925_s5 + $0x148] sm:$0xff] %vm421_vm0, %v391_v43  ;;  %v411_v53 = vpop.permute.xlu1 %410  ;;  %v407_v62 = vpop.permute.xlu0 %406 }
  0xdd   : > { %465 = vst.msk [vmem:[%s2925_s5 + $0x150] sm:$0xff] %vm421_vm0, %v391_v43  ;;  %466 = vst.msk [vmem:[%s2925_s5 + $0x158] sm:$0xff] %vm421_vm0, %v391_v43  ;;  %1388 = vperm.xlu1 %2459, %v2406_v52   ;;  %1384 = vperm.xlu0 %2458, %v2405_v48  }
  0xde   : > { %478 = vst.msk [vmem:[%s2925_s5 + $0x1b8] sm:$0xff] %vm421_vm0, %v403_v46  ;;  %479 = vst.msk [vmem:[%s2925_s5 + $0x1c0] sm:$0xff] %vm421_vm0, %v403_v46 }
  0xdf   : > { %480 = vst.msk [vmem:[%s2925_s5 + $0x1c8] sm:$0xff] %vm421_vm0, %v403_v46  ;;  %481 = vst.msk [vmem:[%s2925_s5 + $0x1d0] sm:$0xff] %vm421_vm0, %v403_v46 }
  0xe0   : > { %482 = vst.msk [vmem:[%s2925_s5 + $0x1d8] sm:$0x3] %vm426_vm1, %v403_v46  ;;  %477 = vst.msk [vmem:[%s2925_s5 + $0x1b0] sm:$0x3] %vm426_vm1, %v399_v47  ;;  %v419_v8 = vpop.permute.xlu1 %418  ;;  %v415_v20 = vpop.permute.xlu0 %414 }
  0xe1   : > { %473 = vst.msk [vmem:[%s2925_s5 + $0x190] sm:$0xff] %vm421_vm0, %v399_v47  ;;  %474 = vst.msk [vmem:[%s2925_s5 + $0x198] sm:$0xff] %vm421_vm0, %v399_v47  ;;  %1396 = vperm.xlu1 %2459, %v2408_v49   ;;  %1392 = vperm.xlu0 %2458, %v2407_v7  }
  0xe2   : > { %475 = vst.msk [vmem:[%s2925_s5 + $0x1a0] sm:$0xff] %vm421_vm0, %v399_v47  ;;  %476 = vst.msk [vmem:[%s2925_s5 + $0x1a8] sm:$0xff] %vm421_vm0, %v399_v47 }
  0xe3   : > { %488 = vst.msk [vmem:[%s2925_s5 + $0x208] sm:$0xff] %vm421_vm0, %v411_v53  ;;  %489 = vst.msk [vmem:[%s2925_s5 + $0x210] sm:$0xff] %vm421_vm0, %v411_v53 }
  0xe4   : > { %490 = vst.msk [vmem:[%s2925_s5 + $0x218] sm:$0xff] %vm421_vm0, %v411_v53  ;;  %491 = vst.msk [vmem:[%s2925_s5 + $0x220] sm:$0xff] %vm421_vm0, %v411_v53  ;;  %v609_v28 = vpop.permute.xlu1 %608  ;;  %v605_v37 = vpop.permute.xlu0 %604 }
  0xe5   : > { %492 = vst.msk [vmem:[%s2925_s5 + $0x228] sm:$0x3] %vm426_vm1, %v411_v53  ;;  %487 = vst.msk [vmem:[%s2925_s5 + $0x200] sm:$0x3] %vm426_vm1, %v407_v62  ;;  %v3194_v18 = vmul.f32 %v609_v28, %v3178_v17  ;;  %v3197_v19 = vmul.f32 %v609_v28, %v3181_v22  ;;  %v3200_v23 = vmul.f32 %v609_v28, %v3184_v26 }
  0xe6   : > { %483 = vst.msk [vmem:[%s2925_s5 + $0x1e0] sm:$0xff] %vm421_vm0, %v407_v62  ;;  %484 = vst.msk [vmem:[%s2925_s5 + $0x1e8] sm:$0xff] %vm421_vm0, %v407_v62  ;;  %v3203_v24 = vmul.f32 %v609_v28, %v3191_v12  ;;  %v3206_v25 = vmul.f32 %v605_v37, %v3178_v17  ;;  %v3209_v21 = vmul.f32 %v605_v37, %v3181_v22 }
  0xe7   : > { %485 = vst.msk [vmem:[%s2925_s5 + $0x1f0] sm:$0xff] %vm421_vm0, %v407_v62  ;;  %486 = vst.msk [vmem:[%s2925_s5 + $0x1f8] sm:$0xff] %vm421_vm0, %v407_v62  ;;  %v3212_v29 = vmul.f32 %v605_v37, %v3184_v26  ;;  %v3219_v33 = vmul.f32 %v605_v37, %v3191_v12 }
  0xe8   : > { %498 = vst.msk [vmem:[%s2925_s5 + $0x258] sm:$0xff] %vm421_vm0, %v419_v8  ;;  %499 = vst.msk [vmem:[%s2925_s5 + $0x260] sm:$0xff] %vm421_vm0, %v419_v8  ;;  %v617_v50 = vpop.permute.xlu1 %616  ;;  %v3135_v51 = vpop.permute.xlu0 %612 }
  0xe9   : > { %500 = vst.msk [vmem:[%s2925_s5 + $0x268] sm:$0xff] %vm421_vm0, %v419_v8  ;;  %501 = vst.msk [vmem:[%s2925_s5 + $0x270] sm:$0xff] %vm421_vm0, %v419_v8  ;;  %v3222_v34 = vmul.f32 %v617_v50, %v3178_v17  ;;  %v3225_v35 = vmul.f32 %v617_v50, %v3181_v22  ;;  %v3228_v36 = vmul.f32 %v617_v50, %v3184_v26 }
  0xea   : > { %502 = vst.msk [vmem:[%s2925_s5 + $0x278] sm:$0x3] %vm426_vm1, %v419_v8  ;;  %497 = vst.msk [vmem:[%s2925_s5 + $0x250] sm:$0x3] %vm426_vm1, %v415_v20  ;;  %v3231_v30 = vmul.f32 %v617_v50, %v3191_v12  ;;  %v3235_v38 = vmul.f32 %v3135_v51, %v3178_v17  ;;  %v3239_v39 = vmul.f32 %v3135_v51, %v3181_v22 }
  0xeb   : > { %493 = vst.msk [vmem:[%s2925_s5 + $0x230] sm:$0xff] %vm421_vm0, %v415_v20  ;;  %494 = vst.msk [vmem:[%s2925_s5 + $0x238] sm:$0xff] %vm421_vm0, %v415_v20  ;;  %v3243_v40 = vmul.f32 %v3135_v51, %v3184_v26 }
  0xec   : > { %495 = vst.msk [vmem:[%s2925_s5 + $0x240] sm:$0xff] %vm421_vm0, %v415_v20  ;;  %496 = vst.msk [vmem:[%s2925_s5 + $0x248] sm:$0xff] %vm421_vm0, %v415_v20  ;;  %v3137_v54 = vpop.permute.xlu1 %624  ;;  %v3139_v55 = vpop.permute.xlu0 %620 }
  0xed   : > { %4408 = vst [vmem:[#allocation5_spill] sm:$0xff] %v3139_v55  ;;  %4419 = vst [vmem:[#allocation16_spill] sm:$0xff] %v3194_v18 }
  0xee   : > { %4420 = vst [vmem:[#allocation17_spill] sm:$0xff] %v3197_v19  ;;  %4421 = vst [vmem:[#allocation18_spill] sm:$0xff] %v3200_v23 }
  0xef   : > { %4422 = vst [vmem:[#allocation19_spill] sm:$0xff] %v3203_v24  ;;  %4423 = vst [vmem:[#allocation20_spill] sm:$0xff] %v3206_v25 }
  0xf0   : > { %v3141_v56 = vpop.permute.xlu1 %632  ;;  %v3143_v57 = vpop.permute.xlu0 %628  ;;  %4424 = vst [vmem:[#allocation21_spill] sm:$0xff] %v3209_v21  ;;  %4425 = vst [vmem:[#allocation22_spill] sm:$0xff] %v3212_v29 }
  0xf1   : > { %4409 = vst [vmem:[#allocation6_spill] sm:$0xff] %v3143_v57  ;;  %4426 = vst [vmem:[#allocation23_spill] sm:$0xff] %v3219_v33 }
  0xf2   : > { %4427 = vst [vmem:[#allocation24_spill] sm:$0xff] %v3222_v34  ;;  %4428 = vst [vmem:[#allocation25_spill] sm:$0xff] %v3225_v35 }
  0xf3   : > { %4429 = vst [vmem:[#allocation26_spill] sm:$0xff] %v3228_v36  ;;  %4430 = vst [vmem:[#allocation27_spill] sm:$0xff] %v3231_v30 }
  0xf4   : > { %v3145_v58 = vpop.permute.xlu1 %640  ;;  %v3147_v59 = vpop.permute.xlu0 %636  ;;  %4431 = vst [vmem:[#allocation28_spill] sm:$0xff] %v3235_v38  ;;  %4432 = vst [vmem:[#allocation29_spill] sm:$0xff] %v3239_v39 }
  0xf5   : > { %4433 = vst [vmem:[#allocation30_spill] sm:$0xff] %v3243_v40 }
  0xf8   : > { %v3149_v60 = vpop.permute.xlu1 %648  ;;  %v3151_v61 = vpop.permute.xlu0 %644 }
  0xf9   : > { %v712_v40 = vmul.f32 %v3149_v60, %v3181_v22  ;;  %v714_v39 = vmul.f32 %v3149_v60, %v3191_v12  ;;  %v708_v38 = vmul.f32 %v3151_v61, %v3181_v22  ;;  %v710_v30 = vmul.f32 %v3151_v61, %v3191_v12 }
  0xfc   : > { %v3153_v63 = vpop.permute.xlu1 %656  ;;  %v3155_v0 = vpop.permute.xlu0 %652 }
  0xfd   : > { %v719_v36 = vmul.f32 %v3153_v63, %v3178_v17  ;;  %v720_v35 = vmul.f32 %v3153_v63, %v3181_v22  ;;  %v721_v34 = vmul.f32 %v3153_v63, %v3184_v26  ;;  %v722_v33 = vmul.f32 %v3153_v63, %v3191_v12 }
  0xfe   : > { %v715_v29 = vmul.f32 %v3155_v0, %v3178_v17  ;;  %v717_v21 = vmul.f32 %v3155_v0, %v3184_v26 }
 0x100   : > { %v665_v1 = vpop.permute.xlu1 %664  ;;  %v661_v2 = vpop.permute.xlu0 %660 }
 0x101   : > { %v727_v41 = vmul.f32 %v665_v1, %v3178_v17  ;;  %v728_v42 = vmul.f32 %v665_v1, %v3181_v22  ;;  %v729_v43 = vmul.f32 %v665_v1, %v3184_v26  ;;  %v730_v44 = vmul.f32 %v665_v1, %v3191_v12 }
 0x102   : > { %v723_v46 = vmul.f32 %v661_v2, %v3178_v17  ;;  %v724_v47 = vmul.f32 %v661_v2, %v3181_v22  ;;  %v725_v52 = vmul.f32 %v661_v2, %v3184_v26  ;;  %v726_v48 = vmul.f32 %v661_v2, %v3191_v12 }
 0x103   : > { %v695_v1 = vmul.f32 %v3141_v56, %v3178_v17  ;;  %v696_v2 = vmul.f32 %v3141_v56, %v3181_v22 }
 0x104   : > { %v3157_v4 = vpop.permute.xlu1 %816  ;;  %v3159_v5 = vpop.permute.xlu0 %812 }
 0x105   : > { %4410 = vst [vmem:[#allocation7_spill] sm:$0xff] %v3157_v4  ;;  %4411 = vst [vmem:[#allocation8_spill] sm:$0xff] %v3159_v5 }
 0x108   : > { %v3161_v3 = vpop.permute.xlu1 %824  ;;  %v3163_v6 = vpop.permute.xlu0 %820 }
 0x109   : > { %4412 = vst [vmem:[#allocation9_spill] sm:$0xff] %v3161_v3  ;;  %4413 = vst [vmem:[#allocation10_spill] sm:$0xff] %v3163_v6  ;;  %v707_v6 = vmul.f32 %v3151_v61, %v3178_v17 }
 0x10c   : > { %v3165_v10 = vpop.permute.xlu1 %832  ;;  %v3167_v11 = vpop.permute.xlu0 %828 }
 0x10d   : > { %4414 = vst [vmem:[#allocation11_spill] sm:$0xff] %v3165_v10  ;;  %4415 = vst [vmem:[#allocation12_spill] sm:$0xff] %v3167_v11  ;;  %v700_v11 = vmul.f32 %v3147_v59, %v3181_v22  ;;  %v701_v10 = vmul.f32 %v3147_v59, %v3184_v26 }
 0x110   : > { %v3169_v13 = vpop.permute.xlu1 %840  ;;  %v3171_v14 = vpop.permute.xlu0 %836 }
 0x111   : > { %4416 = vst [vmem:[#allocation13_spill] sm:$0xff] %v3171_v14  ;;  %v904_v5 = vadd.f32 %v3169_v13, %v696_v2 }
 0x114   : > { %v3173_v15 = vpop.permute.xlu1 %848  ;;  %v3175_v16 = vpop.permute.xlu0 %844 }
 0x118   : > { %v3186_v27 = vpop.permute.xlu1 %856  ;;  %v3188_v9 = vpop.permute.xlu0 %852 }
 0x11c   : > { %v3214_v31 = vpop.permute.xlu1 %864  ;;  %v3216_v32 = vpop.permute.xlu0 %860 }
 0x120   : > { %v873_v45 = vpop.permute.xlu1 %872  ;;  %v869_v53 = vpop.permute.xlu0 %868 }
 0x121   : > { %v3253_v62 = vadd.f32 %v873_v45, %v727_v41  ;;  %v3255_v49 = vadd.f32 %v873_v45, %v728_v42  ;;  %v3257_v7 = vadd.f32 %v873_v45, %v729_v43  ;;  %v3259_v8 = vadd.f32 %v873_v45, %v730_v44 }
 0x122   : > { %v3261_v20 = vadd.f32 %v869_v53, %v723_v46  ;;  %v3263_v28 = vadd.f32 %v869_v53, %v724_v47  ;;  %v3265_v37 = vadd.f32 %v869_v53, %v725_v52  ;;  %v3267_v50 = vadd.f32 %v869_v53, %v726_v48 }
 0x123   : > { %v697_v41 = vmul.f32 %v3141_v56, %v3184_v26  ;;  %v698_v42 = vmul.f32 %v3141_v56, %v3191_v12  ;;  %v691_v43 = vmul.f32 %v3143_v57, %v3178_v17  ;;  %v692_v44 = vmul.f32 %v3143_v57, %v3181_v22 }
 0x124   : > { %v703_v45 = vmul.f32 %v3145_v58, %v3178_v17  ;;  %v704_v46 = vmul.f32 %v3145_v58, %v3181_v22  ;;  %v3285_v47 = vpop.permute.xlu1 %1046  ;;  %v3287_v52 = vpop.permute.xlu0 %1042  ;;  %v705_v48 = vmul.f32 %v3145_v58, %v3184_v26  ;;  %v706_v56 = vmul.f32 %v3145_v58, %v3191_v12 }
 0x125   : > { %4434 = vst [vmem:[#allocation31_spill] sm:$0xff] %v3285_v47  ;;  %4435 = vst [vmem:[#allocation32_spill] sm:$0xff] %v3287_v52  ;;  %v699_v53 = vmul.f32 %v3147_v59, %v3178_v17  ;;  %v702_v47 = vmul.f32 %v3147_v59, %v3191_v12  ;;  %v711_v52 = vmul.f32 %v3149_v60, %v3178_v17 }
 0x126   : > { %v713_v58 = vmul.f32 %v3149_v60, %v3184_v26  ;;  %v709_v59 = vmul.f32 %v3151_v61, %v3184_v26  ;;  %v716_v61 = vmul.f32 %v3155_v0, %v3181_v22  ;;  %v905_v25 = vadd.f32 %v3169_v13, %v697_v41 }
 0x127   : > { %v906_v63 = vadd.f32 %v3169_v13, %v698_v42  ;;  %v899_v24 = vadd.f32 %v3171_v14, %v691_v43  ;;  %v900_v23 = vadd.f32 %v3171_v14, %v692_v44  ;;  %v911_v19 = vadd.f32 %v3173_v15, %v703_v45 }
 0x128   : > { %v3321_v3 = vpop.permute.xlu1 %1054  ;;  %v3323_v60 = vpop.permute.xlu0 %1050  ;;  %v912_v4 = vadd.f32 %v3173_v15, %v704_v46  ;;  %v913_v18 = vadd.f32 %v3173_v15, %v705_v48  ;;  %v907_v41 = vadd.f32 %v3175_v16, %v699_v53  ;;  %v909_v42 = vadd.f32 %v3175_v16, %v701_v10  ;;  %v3364_v53 = vld [vmem:[%s2632_s24 + $0x20] sm:$0xff] }
 0x129   : > { %4436 = vst [vmem:[#allocation33_spill] sm:$0xff] %v3321_v3  ;;  %4437 = vst [vmem:[#allocation34_spill] sm:$0xff] %v3323_v60  ;;  %v718_v3 = vmul.f32 %v3155_v0, %v3191_v12  ;;  %v903_v60 = vadd.f32 %v3169_v13, %v695_v1  ;;  %v914_v0 = vadd.f32 %v3173_v15, %v706_v56 }
 0x12a   : > { %v908_v13 = vadd.f32 %v3175_v16, %v700_v11  ;;  %v910_v43 = vadd.f32 %v3175_v16, %v702_v47  ;;  %v919_v44 = vadd.f32 %v3186_v27, %v711_v52  ;;  %v920_v45 = vadd.f32 %v3186_v27, %v712_v40 }
 0x12b   : > { %v921_v15 = vadd.f32 %v3186_v27, %v713_v58  ;;  %v922_v46 = vadd.f32 %v3186_v27, %v714_v39  ;;  %v915_v48 = vadd.f32 %v3188_v9, %v707_v6  ;;  %v916_v56 = vadd.f32 %v3188_v9, %v708_v38  ;;  %v3379_v6 = vld [vmem:[%s2632_s24 + $0x28] sm:$0xff]  ;;  %v3382_v38 = vld [vmem:[%s2632_s24 + $0x30] sm:$0xff]  ;;  %v3385_v39 = vld [vmem:[%s2632_s24 + $0x38] sm:$0xff] }
 0x12c   : > { %v3347_v1 = vpop.permute.xlu1 %1062  ;;  %v3349_v2 = vpop.permute.xlu0 %1058  ;;  %v917_v11 = vadd.f32 %v3188_v9, %v709_v59  ;;  %v918_v10 = vadd.f32 %v3188_v9, %v710_v30  ;;  %v3367_v16 = vadd.f32 %v3214_v31, %v719_v36  ;;  %v3370_v47 = vadd.f32 %v3214_v31, %v720_v35 }
 0x12d   : > { %4438 = vst [vmem:[#allocation35_spill] sm:$0xff] %v3347_v1  ;;  %4439 = vst [vmem:[#allocation36_spill] sm:$0xff] %v3349_v2  ;;  %v3373_v40 = vadd.f32 %v3214_v31, %v721_v34  ;;  %v3376_v27 = vadd.f32 %v3214_v31, %v722_v33  ;;  %v923_v31 = vadd.f32 %v3216_v32, %v715_v29 }
 0x12e   : > { %v924_v33 = vadd.f32 %v3216_v32, %v716_v61  ;;  %v926_v29 = vadd.f32 %v3216_v32, %v718_v3 }
 0x130   : > { %v1071_v9 = vpop.permute.xlu1 %1070  ;;  %v3387_v30 = vpop.permute.xlu0 %1066 }
 0x131   : > { %4440 = vst [vmem:[#allocation37_spill] sm:$0xff] %v3387_v30  ;;  %v1133_v36 = vmul.f32 %v3364_v53, %v1071_v9  ;;  %v1134_v35 = vmul.f32 %v3379_v6, %v1071_v9  ;;  %v1135_v52 = vmul.f32 %v3382_v38, %v1071_v9  ;;  %v1136_v34 = vmul.f32 %v3385_v39, %v1071_v9 }
 0x132   : > { %v1129_v58 = vmul.f32 %v3364_v53, %v3387_v30  ;;  %v1130_v59 = vmul.f32 %v3379_v6, %v3387_v30  ;;  %v925_v9 = vadd.f32 %v3216_v32, %v717_v21 }
 0x133   : > { %v3399_v2 = vadd.f32 %v1133_v36, %v903_v60  ;;  %v3401_v1 = vadd.f32 %v1134_v35, %v904_v5  ;;  %v3403_v14 = vadd.f32 %v1135_v52, %v905_v25  ;;  %v3405_v57 = vadd.f32 %v1136_v34, %v906_v63 }
 0x134   : > { %v3409_v55 = vadd.f32 %v1129_v58, %v899_v24  ;;  %v3411_v61 = vadd.f32 %v1130_v59, %v900_v23  ;;  %v1079_v26 = vpop.permute.xlu1 %1078  ;;  %v1075_v22 = vpop.permute.xlu0 %1074 }
 0x135   : > { %v1141_v30 = vmul.f32 %v3364_v53, %v1079_v26  ;;  %v1142_v60 = vmul.f32 %v3379_v6, %v1079_v26  ;;  %v1143_v5 = vmul.f32 %v3382_v38, %v1079_v26  ;;  %v1144_v25 = vmul.f32 %v3385_v39, %v1079_v26 }
 0x136   : > { %4441 = vst [vmem:[#allocation38_spill] sm:$0xff] %v3411_v61  ;;  %v1137_v63 = vmul.f32 %v3364_v53, %v1075_v22  ;;  %v1138_v21 = vmul.f32 %v3379_v6, %v1075_v22  ;;  %v1139_v3 = vmul.f32 %v3382_v38, %v1075_v22  ;;  %v1140_v24 = vmul.f32 %v3385_v39, %v1075_v22 }
 0x137   : > { %v3421_v23 = vadd.f32 %v1141_v30, %v911_v19  ;;  %v3423_v32 = vadd.f32 %v1142_v60, %v912_v4  ;;  %v3425_v36 = vadd.f32 %v1143_v5, %v913_v18  ;;  %v3427_v35 = vadd.f32 %v1144_v25, %v914_v0 }
 0x138   : > { %v3429_v52 = vadd.f32 %v1137_v63, %v907_v41  ;;  %v3431_v34 = vadd.f32 %v1138_v21, %v908_v13  ;;  %v3433_v26 = vadd.f32 %v1139_v3, %v909_v42  ;;  %v3435_v58 = vadd.f32 %v1140_v24, %v910_v43  ;;  %v1087_v59 = vpop.permute.xlu1 %1086  ;;  %v1083_v61 = vpop.permute.xlu0 %1082 }
 0x139   : > { %v1149_v22 = vmul.f32 %v3364_v53, %v1087_v59  ;;  %v1150_v19 = vmul.f32 %v3379_v6, %v1087_v59  ;;  %v1151_v4 = vmul.f32 %v3382_v38, %v1087_v59  ;;  %v1152_v18 = vmul.f32 %v3385_v39, %v1087_v59 }
 0x13a   : > { %v1145_v0 = vmul.f32 %v3364_v53, %v1083_v61  ;;  %v1146_v41 = vmul.f32 %v3379_v6, %v1083_v61  ;;  %v1147_v13 = vmul.f32 %v3382_v38, %v1083_v61  ;;  %v1148_v42 = vmul.f32 %v3385_v39, %v1083_v61 }
 0x13b   : > { %v3445_v43 = vadd.f32 %v1149_v22, %v919_v44  ;;  %v3447_v30 = vadd.f32 %v1150_v19, %v920_v45  ;;  %v3449_v60 = vadd.f32 %v1151_v4, %v921_v15  ;;  %v3451_v5 = vadd.f32 %v1152_v18, %v922_v46 }
 0x13c   : > { %v3453_v25 = vadd.f32 %v1145_v0, %v915_v48  ;;  %v3455_v63 = vadd.f32 %v1146_v41, %v916_v56  ;;  %v3457_v21 = vadd.f32 %v1147_v13, %v917_v11  ;;  %v3459_v3 = vadd.f32 %v1148_v42, %v918_v10  ;;  %v1095_v24 = vpop.permute.xlu1 %1094  ;;  %v1091_v59 = vpop.permute.xlu0 %1090 }
 0x13d   : > { %4442 = vst [vmem:[#allocation39_spill] sm:$0xff] %v3445_v43  ;;  %4443 = vst [vmem:[#allocation40_spill] sm:$0xff] %v3447_v30  ;;  %v1157_v61 = vmul.f32 %v3364_v53, %v1095_v24  ;;  %v1158_v44 = vmul.f32 %v3379_v6, %v1095_v24  ;;  %v1159_v45 = vmul.f32 %v3382_v38, %v1095_v24 }
 0x13e   : > { %4444 = vst [vmem:[#allocation41_spill] sm:$0xff] %v3449_v60  ;;  %4445 = vst [vmem:[#allocation42_spill] sm:$0xff] %v3451_v5  ;;  %v1160_v15 = vmul.f32 %v3385_v39, %v1095_v24  ;;  %v1153_v46 = vmul.f32 %v3364_v53, %v1091_v59  ;;  %v1154_v48 = vmul.f32 %v3379_v6, %v1091_v59 }
 0x13f   : > { %4446 = vst [vmem:[#allocation43_spill] sm:$0xff] %v3453_v25  ;;  %4447 = vst [vmem:[#allocation44_spill] sm:$0xff] %v3455_v63  ;;  %v1155_v56 = vmul.f32 %v3382_v38, %v1091_v59  ;;  %v1156_v11 = vmul.f32 %v3385_v39, %v1091_v59  ;;  %v3470_v10 = vadd.f32 %v1157_v61, %v3367_v16  ;;  %v4501_v25 = vld [vmem:[#allocation13_spill] sm:$0xff] }
 0x140   : > { %4448 = vst [vmem:[#allocation45_spill] sm:$0xff] %v3457_v21  ;;  %4449 = vst [vmem:[#allocation46_spill] sm:$0xff] %v3459_v3  ;;  %v3473_v22 = vadd.f32 %v1158_v44, %v3370_v47  ;;  %v3476_v19 = vadd.f32 %v1159_v45, %v3373_v40  ;;  %v3479_v4 = vadd.f32 %v1160_v15, %v3376_v27  ;;  %v1103_v42 = vpop.permute.xlu1 %1102  ;;  %v1099_v16 = vpop.permute.xlu0 %1098 }
 0x141   : > { %4450 = vst [vmem:[#allocation47_spill] sm:$0xff] %v3470_v10  ;;  %v3481_v18 = vadd.f32 %v1153_v46, %v923_v31  ;;  %v3483_v0 = vadd.f32 %v1154_v48, %v924_v33  ;;  %v3485_v41 = vadd.f32 %v1155_v56, %v925_v9  ;;  %v3487_v13 = vadd.f32 %v1156_v11, %v926_v29  ;;  %v4468_v11 = vld [vmem:[#allocation15_spill] sm:$0xff] }
 0x142   : > { %4451 = vst [vmem:[#allocation48_spill] sm:$0xff] %v3473_v22  ;;  %4452 = vst [vmem:[#allocation49_spill] sm:$0xff] %v3476_v19  ;;  %v1165_v24 = vmul.f32 %v3364_v53, %v1103_v42  ;;  %v1166_v47 = vmul.f32 %v3379_v6, %v1103_v42  ;;  %v1167_v40 = vmul.f32 %v3382_v38, %v1103_v42 }
 0x143   : > { %4453 = vst [vmem:[#allocation50_spill] sm:$0xff] %v3479_v4  ;;  %4454 = vst [vmem:[#allocation51_spill] sm:$0xff] %v3481_v18  ;;  %v1168_v59 = vmul.f32 %v3385_v39, %v1103_v42  ;;  %v1161_v27 = vmul.f32 %v3364_v53, %v1099_v16  ;;  %v1162_v31 = vmul.f32 %v3379_v6, %v1099_v16  ;;  %v4469_v42 = vld [vmem:[#allocation5_spill] sm:$0xff]  ;;  %v4487_v18 = vld [vmem:[#allocation27_spill] sm:$0xff] }
 0x144   : > { %4455 = vst [vmem:[#allocation52_spill] sm:$0xff] %v3483_v0  ;;  %4456 = vst [vmem:[#allocation53_spill] sm:$0xff] %v3485_v41  ;;  %v1163_v33 = vmul.f32 %v3382_v38, %v1099_v16  ;;  %v1164_v9 = vmul.f32 %v3385_v39, %v1099_v16  ;;  %v3498_v29 = vadd.f32 %v1165_v24, %v3253_v62  ;;  %v3523_v56 = vpop.permute.xlu0 %1336 }
 0x145   : > { %4457 = vst [vmem:[#allocation54_spill] sm:$0xff] %v3487_v13  ;;  %v3501_v61 = vadd.f32 %v1166_v47, %v3255_v49  ;;  %v3504_v44 = vadd.f32 %v1167_v40, %v3257_v7  ;;  %v3507_v45 = vadd.f32 %v1168_v59, %v3259_v8  ;;  %v3510_v15 = vadd.f32 %v1161_v27, %v3261_v20  ;;  %v3521_v49 = vpop.permute.xlu1 %1340  ;;  %v4467_v20 = vld [vmem:[#allocation14_spill] sm:$0xff]  ;;  %v4484_v13 = vld [vmem:[#allocation9_spill] sm:$0xff] }
 0x146   : > { %4458 = vst [vmem:[#allocation55_spill] sm:$0xff] %v3498_v29  ;;  %v3513_v46 = vadd.f32 %v1162_v31, %v3263_v28  ;;  %v3516_v48 = vadd.f32 %v1163_v33, %v3265_v37  ;;  %v3519_v62 = vadd.f32 %v1164_v9, %v3267_v50  ;;  %4466 = vst [vmem:[#allocation63_spill] sm:$0xff] %v3521_v49  ;;  %v4470_v40 = vld [vmem:[#allocation6_spill] sm:$0xff]  ;;  %v4471_v31 = vld [vmem:[#allocation16_spill] sm:$0xff] }
 0x147   : > { %4459 = vst [vmem:[#allocation56_spill] sm:$0xff] %v3501_v61  ;;  %4460 = vst [vmem:[#allocation57_spill] sm:$0xff] %v3504_v44  ;;  %v678_v7 = vmul.f32 %v3135_v51, %v3191_v12  ;;  %v687_v8 = vmul.f32 %v3137_v54, %v3178_v17  ;;  %v688_v28 = vmul.f32 %v3137_v54, %v4467_v20  ;;  %v4473_v9 = vld [vmem:[#allocation17_spill] sm:$0xff] }
 0x148   : > { %4461 = vst [vmem:[#allocation58_spill] sm:$0xff] %v3507_v45  ;;  %4462 = vst [vmem:[#allocation59_spill] sm:$0xff] %v3510_v15  ;;  %v689_v37 = vmul.f32 %v3137_v54, %v4468_v11  ;;  %v690_v50 = vmul.f32 %v3137_v54, %v3191_v12  ;;  %v683_v16 = vmul.f32 %v4469_v42, %v3178_v17  ;;  %v4472_v54 = vld [vmem:[#allocation7_spill] sm:$0xff]  ;;  %v4476_v15 = vld [vmem:[#allocation20_spill] sm:$0xff] }
 0x149   : > { %4463 = vst [vmem:[#allocation60_spill] sm:$0xff] %v3513_v46  ;;  %4464 = vst [vmem:[#allocation61_spill] sm:$0xff] %v3516_v48  ;;  %v684_v24 = vmul.f32 %v4469_v42, %v4467_v20  ;;  %v685_v51 = vmul.f32 %v4469_v42, %v4468_v11  ;;  %v686_v47 = vmul.f32 %v4469_v42, %v3191_v12  ;;  %v4475_v48 = vld [vmem:[#allocation19_spill] sm:$0xff]  ;;  %v4477_v42 = vld [vmem:[#allocation8_spill] sm:$0xff]  ;;  %v3557_v44 = vpop.permute.xlu1 %1348 }
 0x14a   : > { %4465 = vst [vmem:[#allocation62_spill] sm:$0xff] %v3519_v62  ;;  %v693_v59 = vmul.f32 %v4470_v40, %v4468_v11  ;;  %v694_v27 = vmul.f32 %v4470_v40, %v3191_v12  ;;  %v879_v33 = vadd.f32 %v4472_v54, %v4471_v31  ;;  %v880_v17 = vadd.f32 %v4472_v54, %v4473_v9  ;;  %v4474_v62 = vld [vmem:[#allocation18_spill] sm:$0xff]  ;;  %v3559_v11 = vpop.permute.xlu0 %1344  ;;  %v4480_v12 = vld [vmem:[#allocation21_spill] sm:$0xff]  ;;  %v4482_v9 = vld [vmem:[#allocation23_spill] sm:$0xff] }
 0x14b   : > { %v881_v20 = vadd.f32 %v4472_v54, %v4474_v62  ;;  %v882_v46 = vadd.f32 %v4472_v54, %v4475_v48  ;;  %v875_v45 = vadd.f32 %v4477_v42, %v4476_v15  ;;  %4478 = vst [vmem:[#allocation14_spill] sm:$0xff] %v3557_v44  ;;  %4479 = vst [vmem:[#allocation15_spill] sm:$0xff] %v3559_v11  ;;  %v4481_v31 = vld [vmem:[#allocation22_spill] sm:$0xff]  ;;  %v4483_v62 = vld [vmem:[#allocation24_spill] sm:$0xff] }
 0x14c   : > { %v876_v40 = vadd.f32 %v4477_v42, %v4480_v12  ;;  %v877_v61 = vadd.f32 %v4477_v42, %v4481_v31  ;;  %v878_v29 = vadd.f32 %v4477_v42, %v4482_v9  ;;  %v3569_v41 = vadd.f32 %v4484_v13, %v4483_v62  ;;  %v4485_v48 = vld [vmem:[#allocation25_spill] sm:$0xff]  ;;  %v4486_v54 = vld [vmem:[#allocation26_spill] sm:$0xff]  ;;  %v4488_v31 = vld [vmem:[#allocation28_spill] sm:$0xff] }
 0x14d   : > { %v3573_v15 = vadd.f32 %v4484_v13, %v4485_v48  ;;  %v3577_v0 = vadd.f32 %v4484_v13, %v4486_v54  ;;  %v3581_v12 = vadd.f32 %v4484_v13, %v4487_v18  ;;  %v4489_v11 = vld [vmem:[#allocation10_spill] sm:$0xff]  ;;  %v4490_v42 = vld [vmem:[#allocation29_spill] sm:$0xff]  ;;  %v4492_v54 = vld [vmem:[#allocation11_spill] sm:$0xff]  ;;  %v3639_v49 = vadd.f32 %v4501_v25, %v693_v59 }
 0x14e   : > { %v3585_v44 = vadd.f32 %v4489_v11, %v4488_v31  ;;  %v3589_v9 = vadd.f32 %v4489_v11, %v4490_v42  ;;  %v4491_v62 = vld [vmem:[#allocation30_spill] sm:$0xff]  ;;  %v3596_v4 = vadd.f32 %v4489_v11, %v678_v7  ;;  %v3599_v19 = vadd.f32 %v4492_v54, %v687_v8  ;;  %v4493_v13 = vld [vmem:[#allocation31_spill] sm:$0xff]  ;;  %v3612_v10 = vpop.permute.xlu0 %1352 }
 0x14f   : > { %v3593_v48 = vadd.f32 %v4489_v11, %v4491_v62  ;;  %v3602_v18 = vadd.f32 %v4492_v54, %v688_v28  ;;  %v1109_v31 = vmul.f32 %v3364_v53, %v4493_v13  ;;  %v1110_v42 = vmul.f32 %v3379_v6, %v4493_v13  ;;  %v3610_v62 = vpop.permute.xlu1 %1356  ;;  %4495 = vst [vmem:[#allocation6_spill] sm:$0xff] %v3612_v10  ;;  %v4496_v28 = vld [vmem:[#allocation32_spill] sm:$0xff]  ;;  %v3658_v59 = vld [vmem:[%s2632_s24 + $0x48] sm:$0xff] }
 0x150   : > { %v1111_v22 = vmul.f32 %v3382_v38, %v4493_v13  ;;  %4494 = vst [vmem:[#allocation5_spill] sm:$0xff] %v3610_v62  ;;  %v3615_v7 = vadd.f32 %v4492_v54, %v689_v37  ;;  %v1112_v8 = vmul.f32 %v3385_v39, %v4493_v13  ;;  %v1105_v11 = vmul.f32 %v3364_v53, %v4496_v28  ;;  %v4497_v62 = vld [vmem:[#allocation12_spill] sm:$0xff] }
 0x151   : > { %v1106_v3 = vmul.f32 %v3379_v6, %v4496_v28  ;;  %v3624_v21 = vadd.f32 %v4492_v54, %v690_v50  ;;  %v3627_v63 = vadd.f32 %v4497_v62, %v683_v16  ;;  %v3630_v37 = vadd.f32 %v4497_v62, %v684_v24  ;;  %4502 = vst [vmem:[#allocation18_spill] sm:$0xff] %v3639_v49 }
 0x152   : > { %v3633_v10 = vadd.f32 %v4497_v62, %v685_v51  ;;  %v3636_v13 = vadd.f32 %v4497_v62, %v686_v47  ;;  %v3642_v5 = vadd.f32 %v4501_v25, %v694_v27  ;;  %v1107_v50 = vmul.f32 %v3382_v38, %v4496_v28  ;;  %v3655_v47 = vld [vmem:[%s2632_s24 + $0x40] sm:$0xff] }
 0x153   : > { %4498 = vst [vmem:[#allocation16_spill] sm:$0xff] %v3630_v37  ;;  %v3646_v16 = vadd.f32 %v1109_v31, %v879_v33  ;;  %v3648_v54 = vadd.f32 %v1110_v42, %v880_v17  ;;  %v3650_v24 = vadd.f32 %v1111_v22, %v881_v20  ;;  %v1108_v51 = vmul.f32 %v3385_v39, %v4496_v28  ;;  %v1365_v25 = vpop.permute.xlu1 %1364  ;;  %v4508_v33 = vld [vmem:[#allocation33_spill] sm:$0xff]  ;;  %v3670_v28 = vpop.permute.xlu0 %1360 }
 0x154   : > { %4499 = vst [vmem:[#allocation7_spill] sm:$0xff] %v3633_v10  ;;  %4500 = vst [vmem:[#allocation17_spill] sm:$0xff] %v3636_v13  ;;  %v3660_v27 = vadd.f32 %v1112_v8, %v882_v46  ;;  %v1169_v62 = vadd.f32 %v1105_v11, %v875_v45  ;;  %v1117_v17 = vmul.f32 %v3364_v53, %v4508_v33  ;;  %v4509_v45 = vld [vmem:[#allocation34_spill] sm:$0xff]  ;;  %v3680_v8 = vld [vmem:[%s2632_s24 + $0x58] sm:$0xff] }
 0x155   : > { %4503 = vst [vmem:[#allocation19_spill] sm:$0xff] %v3642_v5  ;;  %4504 = vst [vmem:[#allocation20_spill] sm:$0xff] %v3646_v16  ;;  %v1170_v5 = vadd.f32 %v1106_v3, %v876_v40  ;;  %v1118_v22 = vmul.f32 %v3379_v6, %v4508_v33  ;;  %v1119_v20 = vmul.f32 %v3382_v38, %v4508_v33  ;;  %v3677_v40 = vld [vmem:[%s2632_s24 + $0x50] sm:$0xff]  ;;  %s2530_s24 = smov 1  }
 0x156   : > { %4505 = vst [vmem:[#allocation8_spill] sm:$0xff] %v3648_v54  ;;  %4506 = vst [vmem:[#allocation21_spill] sm:$0xff] %v3650_v24  ;;  %v1427_v31 = vmul.f32 %v3655_v47, %v1365_v25  ;;  %v1428_v42 = vmul.f32 %v3658_v59, %v1365_v25  ;;  %v1120_v46 = vmul.f32 %v3385_v39, %v4508_v33 }
 0x157   : > { %4507 = vst [vmem:[#allocation22_spill] sm:$0xff] %v3660_v27  ;;  %v1113_v3 = vmul.f32 %v3364_v53, %v4509_v45  ;;  %v1399_v11 = vmul.f32 %v3655_v47, %v3523_v56  ;;  %v1400_v24 = vmul.f32 %v3658_v59, %v3523_v56  ;;  %v1114_v27 = vmul.f32 %v3379_v6, %v4509_v45 }
 0x158   : > { %v1115_v16 = vmul.f32 %v3382_v38, %v4509_v45  ;;  %v1429_v33 = vmul.f32 %v3677_v40, %v1365_v25  ;;  %v1430_v54 = vmul.f32 %v3680_v8, %v1365_v25  ;;  %v3693_v49 = vadd.f32 %v1427_v31, %v3399_v2 }
 0x159   : > { %v3696_v13 = vadd.f32 %v1428_v42, %v3401_v1  ;;  %v1423_v10 = vmul.f32 %v3655_v47, %v3670_v28  ;;  %v1424_v60 = vmul.f32 %v3658_v59, %v3670_v28  ;;  %v3702_v30 = vadd.f32 %v1107_v50, %v877_v61  ;;  %v4515_v1 = vld [vmem:[#allocation38_spill] sm:$0xff] }
 0x15a   : > { %4510 = vst [vmem:[#allocation23_spill] sm:$0xff] %v3693_v49  ;;  %v1172_v43 = vadd.f32 %v1108_v51, %v878_v29  ;;  %v3705_v37 = vadd.f32 %v1429_v33, %v3403_v14  ;;  %v3708_v25 = vadd.f32 %v1430_v54, %v3405_v57  ;;  %v3716_v42 = vadd.f32 %v1400_v24, %v1170_v5  ;;  %v1373_v57 = vpop.permute.xlu1 %1372  ;;  %v4518_v51 = vld [vmem:[#allocation36_spill] sm:$0xff] }
 0x15b   : > { %4511 = vst [vmem:[#allocation24_spill] sm:$0xff] %v3696_v13  ;;  %v3711_v2 = vadd.f32 %v1423_v10, %v3409_v55  ;;  %v3714_v31 = vadd.f32 %v1424_v60, %v4515_v1  ;;  %v3718_v13 = vadd.f32 %v1399_v11, %v1169_v62  ;;  %v3721_v61 = vadd.f32 %v1117_v17, %v3569_v41 }
 0x15c   : > { %4512 = vst [vmem:[#allocation9_spill] sm:$0xff] %v3705_v37  ;;  %4513 = vst [vmem:[#allocation25_spill] sm:$0xff] %v3708_v25  ;;  %v3724_v29 = vadd.f32 %v1118_v22, %v3573_v15  ;;  %v3727_v14 = vadd.f32 %v1119_v20, %v3577_v0  ;;  %v1116_v55 = vmul.f32 %v3385_v39, %v4509_v45  ;;  %v4517_v15 = vld [vmem:[#allocation35_spill] sm:$0xff]  ;;  %v4577_v37 = vld [vmem:[#allocation58_spill] sm:$0xff] }
 0x15d   : > { %4514 = vst [vmem:[#allocation26_spill] sm:$0xff] %v3711_v2  ;;  %4516 = vst [vmem:[#allocation27_spill] sm:$0xff] %v3714_v31  ;;  %v3732_v60 = vadd.f32 %v1120_v46, %v3581_v12  ;;  %v3735_v5 = vadd.f32 %v1113_v3, %v3585_v44  ;;  %v3738_v10 = vadd.f32 %v1114_v27, %v3589_v9  ;;  %v1369_v44 = vpop.permute.xlu0 %1368 }
 0x15e   : > { %v3741_v41 = vadd.f32 %v1115_v16, %v3593_v48  ;;  %v1125_v0 = vmul.f32 %v3364_v53, %v4517_v15  ;;  %v1126_v50 = vmul.f32 %v3379_v6, %v4517_v15  ;;  %v1127_v54 = vmul.f32 %v3382_v38, %v4517_v15 }
 0x15f   : > { %v1128_v12 = vmul.f32 %v3385_v39, %v4517_v15  ;;  %v1435_v24 = vmul.f32 %v3655_v47, %v1373_v57  ;;  %v1436_v9 = vmul.f32 %v3658_v59, %v1373_v57  ;;  %v1528_v48 = vmul.f32 0.125, %v3716_v42 }
 0x160   : > { %v1527_v16 = vmul.f32 0.125, %v3718_v13  ;;  %v1121_v27 = vmul.f32 %v3364_v53, %v4518_v51  ;;  %v1122_v62 = vmul.f32 %v3379_v6, %v4518_v51  ;;  %v1437_v17 = vmul.f32 %v3677_v40, %v1373_v57 }
 0x161   : > { %v1438_v22 = vmul.f32 %v3680_v8, %v1373_v57  ;;  %v3762_v20 = vadd.f32 %v1435_v24, %v3421_v23  ;;  %v3765_v46 = vadd.f32 %v1436_v9, %v3423_v32  ;;  %v1431_v45 = vmul.f32 %v3655_v47, %v1369_v44 }
 0x162   : > { %v1432_v3 = vmul.f32 %v3658_v59, %v1369_v44  ;;  %v3770_v11 = vadd.f32 %v1437_v17, %v3425_v36  ;;  %v1433_v6 = vmul.f32 %v3677_v40, %v1369_v44  ;;  %v1434_v33 = vmul.f32 %v3680_v8, %v1369_v44 }
 0x163   : > { %4519 = vst [vmem:[#allocation28_spill] sm:$0xff] %v3762_v20  ;;  %4520 = vst [vmem:[#allocation10_spill] sm:$0xff] %v3765_v46  ;;  %v3773_v53 = vadd.f32 %v1438_v22, %v3427_v35  ;;  %v3778_v23 = vadd.f32 %v1431_v45, %v3429_v52  ;;  %v1592_v1 = vadd.f32 3.0, %v1528_v48  ;;  %v1591_v57 = vadd.f32 3.0, %v1527_v16  ;;  %v1381_v48 = vpop.permute.xlu1 %1380  ;;  %v1377_v22 = vpop.permute.xlu0 %1376 }
 0x164   : > { %4521 = vst [vmem:[#allocation29_spill] sm:$0xff] %v3770_v11  ;;  %v3781_v32 = vadd.f32 %v1432_v3, %v3431_v34  ;;  %v1401_v15 = vmul.f32 %v3677_v40, %v3523_v56  ;;  %v1402_v36 = vmul.f32 %v3680_v8, %v3523_v56  ;;  %v3788_v35 = vadd.f32 %v1433_v6, %v3433_v26 }
 0x165   : > { %4522 = vst [vmem:[#allocation30_spill] sm:$0xff] %v3773_v53  ;;  %4523 = vst [vmem:[#allocation11_spill] sm:$0xff] %v3778_v23  ;;  %v3791_v24 = vadd.f32 %v1434_v33, %v3435_v58  ;;  %v3794_v52 = vadd.f32 %v1116_v55, %v3596_v4  ;;  %v3797_v34 = vadd.f32 %v1125_v0, %v3599_v19  ;;  %v4527_v19 = vld [vmem:[#allocation16_spill] sm:$0xff]  ;;  %v4528_v0 = vld [vmem:[#allocation37_spill] sm:$0xff]  ;;  %v1655_v17 = vmax.f32 %v1591_v57, 0.0 }
 0x166   : > { %4524 = vst [vmem:[#allocation31_spill] sm:$0xff] %v3781_v32  ;;  %4525 = vst [vmem:[#allocation32_spill] sm:$0xff] %v3788_v35  ;;  %v1123_v44 = vmul.f32 %v3382_v38, %v4518_v51  ;;  %v1124_v9 = vmul.f32 %v3385_v39, %v4518_v51  ;;  %v3804_v56 = vadd.f32 %v1126_v50, %v3602_v18  ;;  %v1656_v51 = vmax.f32 %v1592_v1, 0.0  ;;  %v4533_v1 = vld [vmem:[#allocation41_spill] sm:$0xff]  ;;  %v4575_v35 = vld [vmem:[#allocation56_spill] sm:$0xff] }
 0x167   : > { %4526 = vst [vmem:[#allocation12_spill] sm:$0xff] %v3791_v24  ;;  %v3807_v26 = vadd.f32 %v1127_v54, %v3615_v7  ;;  %v3810_v58 = vadd.f32 %v1128_v12, %v3624_v21  ;;  %v3813_v4 = vadd.f32 %v1121_v27, %v3627_v63  ;;  %v3816_v55 = vadd.f32 %v1122_v62, %v4527_v19  ;;  %v4529_v62 = vld [vmem:[#allocation39_spill] sm:$0xff]  ;;  %v4576_v23 = vld [vmem:[#allocation57_spill] sm:$0xff] }
 0x168   : > { %v1131_v16 = vmul.f32 %v3382_v38, %v4528_v0  ;;  %v1443_v18 = vmul.f32 %v3655_v47, %v1381_v48  ;;  %v1444_v7 = vmul.f32 %v3658_v59, %v1381_v48  ;;  %v1466_v50 = vadd.f32 %v1402_v36, %v1172_v43  ;;  %v4531_v38 = vld [vmem:[#allocation40_spill] sm:$0xff] }
 0x169   : > { %v1465_v21 = vadd.f32 %v1401_v15, %v3702_v30  ;;  %v1720_v54 = vmin.f32 %v1656_v51, 6.0  ;;  %v1719_v12 = vmin.f32 %v1655_v17, 6.0  ;;  %v1445_v63 = vmul.f32 %v3677_v40, %v1381_v48  ;;  %v4535_v15 = vld [vmem:[#allocation42_spill] sm:$0xff] }
 0x16a   : > { %v1446_v27 = vmul.f32 %v3680_v8, %v1381_v48  ;;  %v3826_v45 = vadd.f32 %v1443_v18, %v4529_v62  ;;  %v3829_v3 = vadd.f32 %v1444_v7, %v4531_v38  ;;  %v1439_v6 = vmul.f32 %v3655_v47, %v1377_v22  ;;  %v4537_v7 = vld [vmem:[#allocation63_spill] sm:$0xff] }
 0x16b   : > { %v1440_v33 = vmul.f32 %v3658_v59, %v1377_v22  ;;  %v1784_v43 = vmul.f32 %v1720_v54, %v3716_v42  ;;  %v1783_v30 = vmul.f32 %v1719_v12, %v3718_v13  ;;  %v3836_v57 = vadd.f32 %v1445_v63, %v4533_v1  ;;  %v1389_v1 = vpop.permute.xlu1 %1388 }
 0x16c   : > { %4530 = vst [vmem:[#allocation13_spill] sm:$0xff] %v3826_v45  ;;  %4532 = vst [vmem:[#allocation33_spill] sm:$0xff] %v3829_v3  ;;  %v3839_v36 = vadd.f32 %v1446_v27, %v4535_v15  ;;  %v1441_v48 = vmul.f32 %v3677_v40, %v1377_v22  ;;  %v1442_v19 = vmul.f32 %v3680_v8, %v1377_v22  ;;  %v1530_v51 = vmul.f32 0.125, %v1466_v50  ;;  %v4538_v27 = vld [vmem:[#allocation43_spill] sm:$0xff]  ;;  %v4540_v22 = vld [vmem:[#allocation44_spill] sm:$0xff] }
 0x16d   : > { %4534 = vst [vmem:[#allocation34_spill] sm:$0xff] %v3836_v57  ;;  %v1529_v17 = vmul.f32 0.125, %v1465_v21  ;;  %v1132_v18 = vmul.f32 %v3385_v39, %v4528_v0  ;;  %v1403_v42 = vmul.f32 %v3655_v47, %v4537_v7  ;;  %v1848_v54 = vmul.f32 0.16666667, %v1784_v43  ;;  %v4542_v0 = vld [vmem:[#allocation45_spill] sm:$0xff]  ;;  %v4548_v3 = vld [vmem:[#allocation18_spill] sm:$0xff] }
 0x16e   : > { %4536 = vst [vmem:[#allocation38_spill] sm:$0xff] %v3839_v36  ;;  %v1847_v13 = vmul.f32 0.16666667, %v1783_v30  ;;  %v1404_v12 = vmul.f32 %v3658_v59, %v4537_v7  ;;  %v1405_v63 = vmul.f32 %v3677_v40, %v4537_v7  ;;  %v3852_v62 = vadd.f32 %v1439_v6, %v4538_v27  ;;  %v4544_v30 = vld [vmem:[#allocation46_spill] sm:$0xff]  ;;  %v4546_v6 = vld [vmem:[#allocation7_spill] sm:$0xff]  ;;  %v4547_v36 = vld [vmem:[#allocation17_spill] sm:$0xff] }
 0x16f   : > { %v3855_v38 = vadd.f32 %v1440_v33, %v4540_v22  ;;  %v1406_v39 = vmul.f32 %v3680_v8, %v4537_v7  ;;  %1977 = vrot.lane.b32.xlu1 %v1848_v54, %s2530_s24  ;;  %v3862_v43 = vadd.f32 %v1441_v48, %v4542_v0  ;;  %v3865_v15 = vadd.f32 %v1442_v19, %v4544_v30  ;;  %v4549_v45 = vld [vmem:[#allocation19_spill] sm:$0xff]  ;;  %v1385_v30 = vpop.permute.xlu0 %1384 }
 0x170   : > { %4539 = vst [vmem:[#allocation35_spill] sm:$0xff] %v3852_v62  ;;  %1975 = vrot.lane.b32.xlu0 %v1847_v13, %s2530_s24  ;;  %v1187_v27 = vadd.f32 %v1123_v44, %v4546_v6  ;;  %v3869_v33 = vadd.f32 %v1124_v9, %v4547_v36  ;;  %v1594_v22 = vadd.f32 3.0, %v1530_v51  ;;  %v1593_v57 = vadd.f32 3.0, %v1529_v17  ;;  %v4551_v6 = vld [vmem:[#allocation20_spill] sm:$0xff] }
 0x171   : > { %4541 = vst [vmem:[#allocation36_spill] sm:$0xff] %v3855_v38  ;;  %4543 = vst [vmem:[#allocation16_spill] sm:$0xff] %v3862_v43  ;;  %v3872_v7 = vadd.f32 %v1131_v16, %v4548_v3  ;;  %v3875_v54 = vadd.f32 %v1132_v18, %v4549_v45  ;;  %v1451_v13 = vmul.f32 %v3655_v47, %v1389_v1  ;;  %v4552_v16 = vld [vmem:[#allocation22_spill] sm:$0xff]  ;;  %v4553_v45 = vld [vmem:[#allocation21_spill] sm:$0xff] }
 0x172   : > { %4545 = vst [vmem:[#allocation37_spill] sm:$0xff] %v3865_v15  ;;  %v1452_v48 = vmul.f32 %v3658_v59, %v1389_v1  ;;  %v1658_v0 = vmax.f32 %v1594_v22, 0.0  ;;  %v1657_v19 = vmax.f32 %v1593_v57, 0.0  ;;  %v4550_v15 = vld [vmem:[#allocation8_spill] sm:$0xff]  ;;  %v1467_v9 = vadd.f32 %v1403_v42, %v4551_v6  ;;  %v4554_v38 = vld [vmem:[#allocation47_spill] sm:$0xff] }
 0x173   : > { %v1468_v44 = vadd.f32 %v1404_v12, %v4550_v15  ;;  %v1453_v36 = vmul.f32 %v3677_v40, %v1389_v1  ;;  %v1454_v51 = vmul.f32 %v3680_v8, %v1389_v1  ;;  %v3884_v3 = vadd.f32 %v1406_v39, %v4552_v16  ;;  %v4556_v57 = vld [vmem:[#allocation48_spill] sm:$0xff]  ;;  %v4558_v12 = vld [vmem:[#allocation49_spill] sm:$0xff]  ;;  %v4560_v15 = vld [vmem:[#allocation50_spill] sm:$0xff] }
 0x174   : > { %v3887_v17 = vadd.f32 %v1405_v63, %v4553_v45  ;;  %v1722_v18 = vmin.f32 %v1658_v0, 6.0  ;;  %v1721_v43 = vmin.f32 %v1657_v19, 6.0  ;;  %v3890_v22 = vadd.f32 %v1451_v13, %v4554_v38  ;;  %v4562_v45 = vld [vmem:[#allocation14_spill] sm:$0xff] }
 0x175   : > { %v3893_v62 = vadd.f32 %v1452_v48, %v4556_v57  ;;  %v3896_v42 = vadd.f32 %v1453_v36, %v4558_v12  ;;  %v3899_v6 = vadd.f32 %v1454_v51, %v4560_v15  ;;  %v1447_v1 = vmul.f32 %v3655_v47, %v1385_v30  ;;  %v4563_v57 = vld [vmem:[#allocation15_spill] sm:$0xff]  ;;  %v4564_v15 = vld [vmem:[#allocation6_spill] sm:$0xff] }
 0x176   : > { %4555 = vst [vmem:[#allocation39_spill] sm:$0xff] %v3890_v22  ;;  %v1448_v39 = vmul.f32 %v3658_v59, %v1385_v30  ;;  %v1786_v63 = vmul.f32 %v1722_v18, %v1466_v50  ;;  %v1785_v16 = vmul.f32 %v1721_v43, %v1465_v21  ;;  %v1532_v0 = vmul.f32 0.125, %v1468_v44  ;;  %v1397_v18 = vpop.permute.xlu1 %1396 }
 0x177   : > { %4557 = vst [vmem:[#allocation40_spill] sm:$0xff] %v3893_v62  ;;  %4559 = vst [vmem:[#allocation41_spill] sm:$0xff] %v3896_v42  ;;  %v1531_v19 = vmul.f32 0.125, %v1467_v9  ;;  %v3905_v38 = vmul.f32 %v3655_v47, %v4562_v45  ;;  %v3909_v13 = vmul.f32 %v3658_v59, %v4562_v45  ;;  %v1449_v48 = vmul.f32 %v3677_v40, %v1385_v30  ;;  %v4565_v42 = vld [vmem:[#allocation51_spill] sm:$0xff] }
 0x178   : > { %4561 = vst [vmem:[#allocation42_spill] sm:$0xff] %v3899_v6  ;;  %v1450_v36 = vmul.f32 %v3680_v8, %v1385_v30  ;;  %v3915_v51 = vmul.f32 %v3677_v40, %v4562_v45  ;;  %v3919_v50 = vmul.f32 %v3680_v8, %v4562_v45  ;;  %v1850_v21 = vmul.f32 0.16666667, %v1786_v63  ;;  %v4567_v30 = vld [vmem:[#allocation52_spill] sm:$0xff]  ;;  %v4569_v45 = vld [vmem:[#allocation53_spill] sm:$0xff] }
 0x179   : > { %v1849_v43 = vmul.f32 0.16666667, %v1785_v16  ;;  %v1407_v12 = vmul.f32 %v3655_v47, %v4563_v57  ;;  %v1417_v6 = vmul.f32 %v3677_v40, %v4564_v15  ;;  %v3926_v62 = vadd.f32 %v1447_v1, %v4565_v42  ;;  %v4571_v16 = vld [vmem:[#allocation54_spill] sm:$0xff] }
 0x17a   : > { %v3929_v22 = vadd.f32 %v1448_v39, %v4567_v30  ;;  %1981 = vrot.lane.b32.xlu1 %v1850_v21, %s2530_s24  ;;  %v3934_v63 = vadd.f32 %v1449_v48, %v4569_v45  ;;  %v3937_v53 = vadd.f32 %v1450_v36, %v4571_v16  ;;  %v1596_v11 = vadd.f32 3.0, %v1532_v0  ;;  %v4573_v21 = vld [vmem:[#allocation5_spill] sm:$0xff] }
 0x17b   : > { %4566 = vst [vmem:[#allocation63_spill] sm:$0xff] %v3926_v62  ;;  %1979 = vrot.lane.b32.xlu0 %v1849_v43, %s2530_s24  ;;  %v1595_v46 = vadd.f32 3.0, %v1531_v19  ;;  %v1408_v20 = vmul.f32 %v3658_v59, %v4563_v57  ;;  %v3943_v42 = vmul.f32 %v3677_v40, %v4563_v57  ;;  %v1459_v1 = vmul.f32 %v3655_v47, %v1397_v18  ;;  %v4574_v62 = vld [vmem:[#allocation55_spill] sm:$0xff] }
 0x17c   : > { %4568 = vst [vmem:[#allocation43_spill] sm:$0xff] %v3929_v22  ;;  %4570 = vst [vmem:[#allocation44_spill] sm:$0xff] %v3934_v63  ;;  %v1460_v39 = vmul.f32 %v3658_v59, %v1397_v18  ;;  %v1419_v48 = vmul.f32 %v3655_v47, %v4573_v21  ;;  %v1660_v43 = vmax.f32 %v1596_v11, 0.0  ;;  %v1534_v36 = vmul.f32 0.125, %v3884_v3 }
 0x17d   : > { %4572 = vst [vmem:[#allocation45_spill] sm:$0xff] %v3937_v53  ;;  %v1659_v30 = vmax.f32 %v1595_v46, 0.0  ;;  %v1420_v0 = vmul.f32 %v3658_v59, %v4573_v21  ;;  %v1421_v19 = vmul.f32 %v3677_v40, %v4573_v21  ;;  %v1461_v45 = vmul.f32 %v3677_v40, %v1397_v18  ;;  %v1393_v53 = vpop.permute.xlu0 %1392 }
 0x17e   : > { %v1462_v16 = vmul.f32 %v3680_v8, %v1397_v18  ;;  %v1418_v63 = vmul.f32 %v3680_v8, %v4564_v15  ;;  %v3958_v22 = vadd.f32 %v1417_v6, %v1187_v27  ;;  %v1724_v11 = vmin.f32 %v1660_v43, 6.0 }
 0x17f   : > { %v1723_v46 = vmin.f32 %v1659_v30, 6.0  ;;  %v3961_v24 = vadd.f32 %v1459_v1, %v4574_v62  ;;  %v3964_v32 = vadd.f32 %v1460_v39, %v4575_v35  ;;  %v3967_v25 = vadd.f32 %v1461_v45, %v4576_v23 }
 0x180   : > { %v3970_v49 = vadd.f32 %v1462_v16, %v4577_v37  ;;  %v1788_v18 = vmul.f32 %v1724_v11, %v1468_v44  ;;  %v1455_v2 = vmul.f32 %v3655_v47, %v1393_v53  ;;  %v1456_v27 = vmul.f32 %v3658_v59, %v1393_v53 }
 0x181   : > { %v1787_v31 = vmul.f32 %v1723_v46, %v1467_v9  ;;  %v1410_v6 = vmul.f32 %v3680_v8, %v4563_v57  ;;  %v1422_v62 = vmul.f32 %v3680_v8, %v4573_v21  ;;  %v3979_v35 = vadd.f32 %v1419_v48, %v3797_v34  ;;  %v4579_v48 = vld [vmem:[#allocation60_spill] sm:$0xff] }
 0x182   : > { %v1533_v23 = vmul.f32 0.125, %v3887_v17  ;;  %v1852_v1 = vmul.f32 0.16666667, %v1788_v18  ;;  %v1457_v44 = vmul.f32 %v3677_v40, %v1393_v53  ;;  %v1458_v9 = vmul.f32 %v3680_v8, %v1393_v53 }
 0x183   : > { %v1851_v37 = vmul.f32 0.16666667, %v1787_v31  ;;  %v3985_v39 = vadd.f32 %v1420_v0, %v3804_v56  ;;  %v3988_v43 = vadd.f32 %v1421_v19, %v3807_v26  ;;  %v3991_v57 = vadd.f32 %v1418_v63, %v3869_v33  ;;  %v4578_v31 = vld [vmem:[#allocation59_spill] sm:$0xff]  ;;  %v4580_v56 = vld [vmem:[#allocation61_spill] sm:$0xff]  ;;  %v4581_v0 = vld [vmem:[#allocation62_spill] sm:$0xff] }
 0x184   : > { %v1545_v34 = vmul.f32 0.125, %v3958_v22  ;;  %1985 = vrot.lane.b32.xlu1 %v1852_v1, %s2530_s24  ;;  %v3997_v21 = vadd.f32 %v1455_v2, %v4578_v31  ;;  %v4000_v53 = vadd.f32 %v1456_v27, %v4579_v48  ;;  %v4003_v30 = vadd.f32 %v1457_v44, %v4580_v56 }
 0x185   : > { %1983 = vrot.lane.b32.xlu0 %v1851_v37, %s2530_s24  ;;  %v1598_v26 = vadd.f32 3.0, %v1534_v36  ;;  %v4006_v19 = vadd.f32 %v1458_v9, %v4581_v0  ;;  %v1597_v33 = vadd.f32 3.0, %v1533_v23  ;;  %v1472_v63 = vadd.f32 %v1408_v20, %v3738_v10 }
 0x186   : > { %v1471_v45 = vadd.f32 %v1407_v12, %v3735_v5  ;;  %v4011_v16 = vadd.f32 %v1422_v62, %v3810_v58  ;;  %v1415_v2 = vmul.f32 %v3655_v47, %v4564_v15  ;;  %v1416_v11 = vmul.f32 %v3658_v59, %v4564_v15 }
 0x187   : > { %v1662_v46 = vmax.f32 %v1598_v26, 0.0  ;;  %v4018_v36 = vmul.f32 0.125, %v3979_v35  ;;  %v1661_v18 = vmax.f32 %v1597_v33, 0.0  ;;  %v1536_v27 = vmul.f32 0.125, %v1472_v63 }
 0x188   : > { %v1535_v23 = vmul.f32 0.125, %v1471_v45  ;;  %v4021_v10 = vmul.f32 0.125, %v3985_v39  ;;  %v4024_v5 = vmul.f32 0.125, %v3988_v43  ;;  %v1546_v20 = vmul.f32 0.125, %v3991_v57 }
 0x189   : > { %v1726_v58 = vmin.f32 %v1662_v46, 6.0  ;;  %v4027_v47 = vadd.f32 3.0, %v1545_v34  ;;  %v1725_v12 = vmin.f32 %v1661_v18, 6.0  ;;  %v1600_v59 = vadd.f32 3.0, %v1536_v27 }
 0x18a   : > { %v1599_v15 = vadd.f32 3.0, %v1535_v23  ;;  %v1474_v1 = vadd.f32 %v1410_v6, %v3794_v52  ;;  %v1473_v37 = vadd.f32 %v3943_v42, %v3741_v41  ;;  %v1476_v44 = vadd.f32 %v3909_v13, %v3724_v29 }
 0x18b   : > { %v1790_v62 = vmul.f32 %v1726_v58, %v3884_v3  ;;  %v1789_v9 = vmul.f32 %v1725_v12, %v3887_v17  ;;  %v1664_v31 = vmax.f32 %v1600_v59, 0.0  ;;  %v1475_v34 = vadd.f32 %v3905_v38, %v3721_v61 }
 0x18c   : > { %v1663_v48 = vmax.f32 %v1599_v15, 0.0  ;;  %v1538_v26 = vmul.f32 0.125, %v1474_v1  ;;  %v1537_v0 = vmul.f32 0.125, %v1473_v37  ;;  %v1540_v33 = vmul.f32 0.125, %v1476_v44 }
 0x18d   : > { %v1854_v56 = vmul.f32 0.16666667, %v1790_v62  ;;  %v1853_v3 = vmul.f32 0.16666667, %v1789_v9  ;;  %v1728_v46 = vmin.f32 %v1664_v31, 6.0  ;;  %v1539_v6 = vmul.f32 0.125, %v1475_v34 }
 0x18e   : > { %v1727_v52 = vmin.f32 %v1663_v48, 6.0  ;;  %v1602_v41 = vadd.f32 3.0, %v1538_v26  ;;  %v1601_v42 = vadd.f32 3.0, %v1537_v0  ;;  %v1604_v29 = vadd.f32 3.0, %v1540_v33 }
 0x18f   : > { %1989 = vrot.lane.b32.xlu1 %v1854_v56, %s2530_s24  ;;  %v1478_v17 = vadd.f32 %v3919_v50, %v3732_v60  ;;  %1987 = vrot.lane.b32.xlu0 %v1853_v3, %s2530_s24  ;;  %v1792_v13 = vmul.f32 %v1728_v46, %v1472_v63  ;;  %v1603_v38 = vadd.f32 3.0, %v1539_v6  ;;  %v1477_v18 = vadd.f32 %v3915_v51, %v3727_v14 }
 0x190   : > { %v1791_v61 = vmul.f32 %v1727_v52, %v1471_v45  ;;  %v1666_v27 = vmax.f32 %v1602_v41, 0.0  ;;  %v1665_v23 = vmax.f32 %v1601_v42, 0.0  ;;  %v1668_v58 = vmax.f32 %v1604_v29, 0.0 }
 0x191   : > { %v1542_v12 = vmul.f32 0.125, %v1478_v17  ;;  %v1856_v59 = vmul.f32 0.16666667, %v1792_v13  ;;  %v1667_v62 = vmax.f32 %v1603_v38, 0.0  ;;  %v1541_v9 = vmul.f32 0.125, %v1477_v18 }
 0x192   : > { %v1855_v15 = vmul.f32 0.16666667, %v1791_v61  ;;  %v1730_v31 = vmin.f32 %v1666_v27, 6.0  ;;  %v1729_v48 = vmin.f32 %v1665_v23, 6.0  ;;  %v1732_v56 = vmin.f32 %v1668_v58, 6.0 }
 0x193   : > { %v1606_v60 = vadd.f32 3.0, %v1542_v12  ;;  %1993 = vrot.lane.b32.xlu1 %v1856_v59, %s2530_s24  ;;  %v1731_v50 = vmin.f32 %v1667_v62, 6.0  ;;  %v1605_v63 = vadd.f32 3.0, %v1541_v9  ;;  %v1480_v14 = vadd.f32 %v1416_v11, %v3816_v55  ;;  %v4583_v9 = vld [vmem:[#allocation27_spill] sm:$0xff] }
 0x194   : > { %1991 = vrot.lane.b32.xlu0 %v1855_v15, %s2530_s24  ;;  %v1479_v51 = vadd.f32 %v1415_v2, %v3813_v4  ;;  %v1610_v45 = vadd.f32 3.0, %v1546_v20  ;;  %v1794_v26 = vmul.f32 %v1730_v31, %v1474_v1  ;;  %v1793_v0 = vmul.f32 %v1729_v48, %v1473_v37  ;;  %v4582_v15 = vld [vmem:[#allocation26_spill] sm:$0xff] }
 0x195   : > { %v1670_v33 = vmax.f32 %v1606_v60, 0.0  ;;  %v1796_v3 = vmul.f32 %v1732_v56, %v1476_v44  ;;  %v1669_v46 = vmax.f32 %v1605_v63, 0.0  ;;  %v1544_v52 = vmul.f32 0.125, %v1480_v14 }
 0x196   : > { %v1543_v6 = vmul.f32 0.125, %v1479_v51  ;;  %v1550_v41 = vmul.f32 0.125, %v4011_v16  ;;  %v1858_v42 = vmul.f32 0.16666667, %v1794_v26  ;;  %v1857_v29 = vmul.f32 0.16666667, %v1793_v0 }
 0x197   : > { %v1795_v13 = vmul.f32 %v1731_v50, %v1475_v34  ;;  %v1425_v61 = vmul.f32 %v3677_v40, %v3670_v28  ;;  %v1734_v38 = vmin.f32 %v1670_v33, 6.0  ;;  %v1733_v55 = vmin.f32 %v1669_v46, 6.0 }
 0x198   : > { %v1608_v11 = vadd.f32 3.0, %v1544_v52  ;;  %v1611_v4 = vadd.f32 3.0, %v4018_v36  ;;  %v1612_v2 = vadd.f32 3.0, %v4021_v10  ;;  %v1426_v20 = vmul.f32 %v3680_v8, %v3670_v28  ;;  %1997 = vrot.lane.b32.xlu1 %v1858_v42, %s2530_s24  ;;  %1995 = vrot.lane.b32.xlu0 %v1857_v29, %s2530_s24  ;;  %v4585_v29 = vld [vmem:[#allocation24_spill] sm:$0xff] }
 0x199   : > { %v1607_v1 = vadd.f32 3.0, %v1543_v6  ;;  %v1860_v37 = vmul.f32 0.16666667, %v1796_v3  ;;  %v1674_v34 = vmax.f32 %v1610_v45, 0.0  ;;  %v1673_v40 = vmax.f32 %v4027_v47, 0.0 }
 0x19a   : > { %v1672_v44 = vmax.f32 %v1608_v11, 0.0  ;;  %v1859_v27 = vmul.f32 0.16666667, %v1795_v13  ;;  %v1798_v23 = vmul.f32 %v1734_v38, %v1478_v17  ;;  %v1797_v58 = vmul.f32 %v1733_v55, %v1477_v18 }
 0x19b   : > { %v1671_v12 = vmax.f32 %v1607_v1, 0.0  ;;  %v1613_v36 = vadd.f32 3.0, %v4024_v5  ;;  %v1614_v10 = vadd.f32 3.0, %v1550_v41  ;;  %v4060_v59 = vadd.f32 %v1425_v61, %v3872_v7  ;;  %v4584_v41 = vld [vmem:[#allocation23_spill] sm:$0xff] }
 0x19c   : > { %v1736_v28 = vmin.f32 %v1672_v44, 6.0  ;;  %v4063_v8 = vadd.f32 %v1426_v20, %v3875_v54  ;;  %v1551_v62 = vmul.f32 0.125, %v4582_v15  ;;  %v1552_v31 = vmul.f32 0.125, %v4583_v9  ;;  %2001 = vrot.lane.b32.xlu1 %v1860_v37, %s2530_s24  ;;  %1999 = vrot.lane.b32.xlu0 %v1859_v27, %s2530_s24  ;;  %v4586_v37 = vld [vmem:[#allocation9_spill] sm:$0xff] }
 0x19d   : > { %v1735_v47 = vmin.f32 %v1671_v12, 6.0  ;;  %v1738_v17 = vmin.f32 %v1674_v34, 6.0  ;;  %v1737_v18 = vmin.f32 %v1673_v40, 6.0  ;;  %v1676_v5 = vmax.f32 %v1612_v2, 0.0  ;;  %v4587_v34 = vld [vmem:[#allocation25_spill] sm:$0xff] }
 0x19e   : > { %v1675_v48 = vmax.f32 %v1611_v4, 0.0  ;;  %v1862_v56 = vmul.f32 0.16666667, %v1798_v23  ;;  %v1861_v7 = vmul.f32 0.16666667, %v1797_v58  ;;  %v1800_v60 = vmul.f32 %v1736_v28, %v1480_v14 }
 0x19f   : > { %v1799_v50 = vmul.f32 %v1735_v47, %v1479_v51  ;;  %v1553_v54 = vmul.f32 0.125, %v4060_v59  ;;  %v1554_v63 = vmul.f32 0.125, %v4063_v8  ;;  %v1615_v45 = vadd.f32 3.0, %v1551_v62 }
 0x1a0   : > { %v1616_v26 = vadd.f32 3.0, %v1552_v31  ;;  %2005 = vrot.lane.b32.xlu1 %v1862_v56, %s2530_s24  ;;  %2003 = vrot.lane.b32.xlu0 %v1861_v7, %s2530_s24  ;;  %v1802_v0 = vmul.f32 %v1738_v17, %v3991_v57  ;;  %v1801_v33 = vmul.f32 %v1737_v18, %v3958_v22  ;;  %v1740_v3 = vmin.f32 %v1676_v5, 6.0  ;;  %v4588_v17 = vld [vmem:[#allocation11_spill] sm:$0xff] }
 0x1a1   : > { %v1739_v46 = vmin.f32 %v1675_v48, 6.0  ;;  %v1864_v52 = vmul.f32 0.16666667, %v1800_v60  ;;  %v1863_v6 = vmul.f32 0.16666667, %v1799_v50  ;;  %v1678_v14 = vmax.f32 %v1614_v10, 0.0 }
 0x1a2   : > { %v1677_v51 = vmax.f32 %v1613_v36, 0.0  ;;  %v1555_v42 = vmul.f32 0.125, %v4584_v41  ;;  %v1556_v13 = vmul.f32 0.125, %v4585_v29  ;;  %v1617_v61 = vadd.f32 3.0, %v1553_v54  ;;  %v4589_v5 = vld [vmem:[#allocation31_spill] sm:$0xff] }
 0x1a3   : > { %v1618_v38 = vadd.f32 3.0, %v1554_v63  ;;  %v1866_v55 = vmul.f32 0.16666667, %v1802_v0  ;;  %v1865_v57 = vmul.f32 0.16666667, %v1801_v33  ;;  %v1804_v22 = vmul.f32 %v1740_v3, %v3985_v39  ;;  %v4591_v0 = vld [vmem:[#allocation12_spill] sm:$0xff] }
 0x1a4   : > { %2009 = vrot.lane.b32.xlu1 %v1864_v52, %s2530_s24  ;;  %2007 = vrot.lane.b32.xlu0 %v1863_v6, %s2530_s24  ;;  %v1803_v11 = vmul.f32 %v1739_v46, %v3979_v35  ;;  %v1742_v4 = vmin.f32 %v1678_v14, 6.0  ;;  %v1741_v2 = vmin.f32 %v1677_v51, 6.0  ;;  %v1680_v20 = vmax.f32 %v1616_v26, 0.0 }
 0x1a5   : > { %v1679_v1 = vmax.f32 %v1615_v45, 0.0  ;;  %v1557_v44 = vmul.f32 0.125, %v4586_v37  ;;  %v1558_v40 = vmul.f32 0.125, %v4587_v34  ;;  %v1619_v27 = vadd.f32 3.0, %v1555_v42  ;;  %v4590_v45 = vld [vmem:[#allocation32_spill] sm:$0xff] }
 0x1a6   : > { %v1620_v23 = vadd.f32 3.0, %v1556_v13  ;;  %v1868_v58 = vmul.f32 0.16666667, %v1804_v22  ;;  %v1867_v12 = vmul.f32 0.16666667, %v1803_v11  ;;  %v1682_v36 = vmax.f32 %v1618_v38, 0.0 }
 0x1a7   : > { %v1681_v39 = vmax.f32 %v1617_v61, 0.0  ;;  %v1806_v35 = vmul.f32 %v1742_v4, %v4011_v16  ;;  %v1805_v10 = vmul.f32 %v1741_v2, %v3988_v43  ;;  %v1744_v28 = vmin.f32 %v1680_v20, 6.0  ;;  %v4592_v61 = vld [vmem:[#allocation28_spill] sm:$0xff] }
 0x1a8   : > { %2013 = vrot.lane.b32.xlu1 %v1866_v55, %s2530_s24  ;;  %2011 = vrot.lane.b32.xlu0 %v1865_v57, %s2530_s24  ;;  %v1743_v62 = vmin.f32 %v1679_v1, 6.0  ;;  %v1621_v31 = vadd.f32 3.0, %v1557_v44  ;;  %v1622_v47 = vadd.f32 3.0, %v1558_v40  ;;  %v1559_v18 = vmul.f32 0.125, %v4588_v17  ;;  %v4593_v55 = vld [vmem:[#allocation10_spill] sm:$0xff] }
 0x1a9   : > { %v1560_v48 = vmul.f32 0.125, %v4589_v5  ;;  %v1746_v56 = vmin.f32 %v1682_v36, 6.0  ;;  %v1745_v7 = vmin.f32 %v1681_v39, 6.0  ;;  %v1684_v60 = vmax.f32 %v1620_v23, 0.0 }
 0x1aa   : > { %v1683_v50 = vmax.f32 %v1619_v27, 0.0  ;;  %v1870_v54 = vmul.f32 0.16666667, %v1806_v35  ;;  %v1869_v16 = vmul.f32 0.16666667, %v1805_v10  ;;  %v1808_v43 = vmul.f32 %v1744_v28, %v4583_v9  ;;  %v4594_v27 = vld [vmem:[#allocation29_spill] sm:$0xff] }
 0x1ab   : > { %v1807_v63 = vmul.f32 %v1743_v62, %v4582_v15  ;;  %v1561_v26 = vmul.f32 0.125, %v4590_v45  ;;  %v1562_v33 = vmul.f32 0.125, %v4591_v0  ;;  %v1623_v3 = vadd.f32 3.0, %v1559_v18 }
 0x1ac   : > { %2017 = vrot.lane.b32.xlu1 %v1868_v58, %s2530_s24  ;;  %2015 = vrot.lane.b32.xlu0 %v1867_v12, %s2530_s24  ;;  %v1624_v46 = vadd.f32 3.0, %v1560_v48  ;;  %v1810_v52 = vmul.f32 %v1746_v56, %v4063_v8  ;;  %v1809_v6 = vmul.f32 %v1745_v7, %v4060_v59  ;;  %v1748_v14 = vmin.f32 %v1684_v60, 6.0  ;;  %v4595_v58 = vld [vmem:[#allocation30_spill] sm:$0xff]  ;;  %v4596_v56 = vld [vmem:[#allocation35_spill] sm:$0xff]  ;;  %v4597_v60 = vld [vmem:[#allocation36_spill] sm:$0xff] }
 0x1ad   : > { %v1747_v51 = vmin.f32 %v1683_v50, 6.0  ;;  %v1872_v42 = vmul.f32 0.16666667, %v1808_v43  ;;  %v1871_v9 = vmul.f32 0.16666667, %v1807_v63  ;;  %v1686_v13 = vmax.f32 %v1622_v47, 0.0 }
 0x1ae   : > { %v1685_v15 = vmax.f32 %v1621_v31, 0.0  ;;  %v1563_v38 = vmul.f32 0.125, %v4592_v61  ;;  %v1564_v57 = vmul.f32 0.125, %v4593_v55  ;;  %v1625_v22 = vadd.f32 3.0, %v1561_v26 }
 0x1af   : > { %v1626_v11 = vadd.f32 3.0, %v1562_v33  ;;  %v1874_v4 = vmul.f32 0.16666667, %v1810_v52  ;;  %v1873_v8 = vmul.f32 0.16666667, %v1809_v6  ;;  %v1812_v59 = vmul.f32 %v1748_v14, %v4585_v29  ;;  %v4599_v52 = vld [vmem:[#allocation37_spill] sm:$0xff] }
 0x1b0   : > { %2021 = vrot.lane.b32.xlu1 %v1870_v54, %s2530_s24  ;;  %2019 = vrot.lane.b32.xlu0 %v1869_v16, %s2530_s24  ;;  %v1811_v2 = vmul.f32 %v1747_v51, %v4584_v41  ;;  %v1750_v20 = vmin.f32 %v1686_v13, 6.0  ;;  %v1749_v1 = vmin.f32 %v1685_v15, 6.0  ;;  %v1688_v44 = vmax.f32 %v1624_v46, 0.0 }
 0x1b1   : > { %v1687_v40 = vmax.f32 %v1623_v3, 0.0  ;;  %v1565_v23 = vmul.f32 0.125, %v4594_v27  ;;  %v1566_v12 = vmul.f32 0.125, %v4595_v58  ;;  %v1627_v36 = vadd.f32 3.0, %v1563_v38  ;;  %v4598_v3 = vld [vmem:[#allocation16_spill] sm:$0xff] }
 0x1b2   : > { %v1628_v39 = vadd.f32 3.0, %v1564_v57  ;;  %v1876_v35 = vmul.f32 0.16666667, %v1812_v59  ;;  %v1875_v10 = vmul.f32 0.16666667, %v1811_v2  ;;  %v1690_v28 = vmax.f32 %v1626_v11, 0.0 }
 0x1b3   : > { %v1689_v29 = vmax.f32 %v1625_v22, 0.0  ;;  %v1814_v41 = vmul.f32 %v1750_v20, %v4587_v34  ;;  %v1813_v62 = vmul.f32 %v1749_v1, %v4586_v37  ;;  %v1752_v31 = vmin.f32 %v1688_v44, 6.0  ;;  %v4600_v22 = vld [vmem:[#allocation13_spill] sm:$0xff] }
 0x1b4   : > { %2025 = vrot.lane.b32.xlu1 %v1872_v42, %s2530_s24  ;;  %2023 = vrot.lane.b32.xlu0 %v1871_v9, %s2530_s24  ;;  %v1751_v47 = vmin.f32 %v1687_v40, 6.0  ;;  %v1629_v18 = vadd.f32 3.0, %v1565_v23  ;;  %v1630_v48 = vadd.f32 3.0, %v1566_v12  ;;  %v1567_v7 = vmul.f32 0.125, %v4596_v56 }
 0x1b5   : > { %v1568_v50 = vmul.f32 0.125, %v4597_v60  ;;  %v1754_v54 = vmin.f32 %v1690_v28, 6.0  ;;  %v1753_v16 = vmin.f32 %v1689_v29, 6.0  ;;  %v1692_v43 = vmax.f32 %v1628_v39, 0.0 }
 0x1b6   : > { %v1691_v63 = vmax.f32 %v1627_v36, 0.0  ;;  %v1878_v26 = vmul.f32 0.16666667, %v1814_v41  ;;  %v1877_v34 = vmul.f32 0.16666667, %v1813_v62  ;;  %v1816_v37 = vmul.f32 %v1752_v31, %v4589_v5  ;;  %v4602_v36 = vld [vmem:[#allocation34_spill] sm:$0xff] }
 0x1b7   : > { %v1815_v33 = vmul.f32 %v1751_v47, %v4588_v17  ;;  %v1569_v46 = vmul.f32 0.125, %v4598_v3  ;;  %v1570_v6 = vmul.f32 0.125, %v4599_v52  ;;  %v1631_v14 = vadd.f32 3.0, %v1567_v7 }
 0x1b8   : > { %2029 = vrot.lane.b32.xlu1 %v1874_v4, %s2530_s24  ;;  %2027 = vrot.lane.b32.xlu0 %v1873_v8, %s2530_s24  ;;  %v1632_v51 = vadd.f32 3.0, %v1568_v50  ;;  %v1818_v42 = vmul.f32 %v1754_v54, %v4591_v0  ;;  %v1817_v9 = vmul.f32 %v1753_v16, %v4590_v45  ;;  %v1756_v13 = vmin.f32 %v1692_v43, 6.0  ;;  %v4601_v4 = vld [vmem:[#allocation33_spill] sm:$0xff]  ;;  %v4604_v54 = vld [vmem:[#allocation63_spill] sm:$0xff] }
 0x1b9   : > { %v1755_v15 = vmin.f32 %v1691_v63, 6.0  ;;  %v1880_v38 = vmul.f32 0.16666667, %v1816_v37  ;;  %v1879_v5 = vmul.f32 0.16666667, %v1815_v33  ;;  %v1694_v57 = vmax.f32 %v1630_v48, 0.0 }
 0x1ba   : > { %v1693_v17 = vmax.f32 %v1629_v18, 0.0  ;;  %v1571_v11 = vmul.f32 0.125, %v4600_v22  ;;  %v1572_v8 = vmul.f32 0.125, %v4601_v4  ;;  %v1633_v59 = vadd.f32 3.0, %v1569_v46  ;;  %v4605_v43 = vld [vmem:[#allocation43_spill] sm:$0xff] }
 0x1bb   : > { %v1634_v2 = vadd.f32 3.0, %v1570_v6  ;;  %v1882_v20 = vmul.f32 0.16666667, %v1818_v42  ;;  %v1881_v0 = vmul.f32 0.16666667, %v1817_v9  ;;  %v1820_v45 = vmul.f32 %v1756_v13, %v4593_v55  ;;  %v4607_v42 = vld [vmem:[#allocation45_spill] sm:$0xff] }
 0x1bc   : > { %2033 = vrot.lane.b32.xlu1 %v1876_v35, %s2530_s24  ;;  %2031 = vrot.lane.b32.xlu0 %v1875_v10, %s2530_s24  ;;  %v1819_v1 = vmul.f32 %v1755_v15, %v4592_v61  ;;  %v1758_v44 = vmin.f32 %v1694_v57, 6.0  ;;  %v1757_v40 = vmin.f32 %v1693_v17, 6.0  ;;  %v1696_v23 = vmax.f32 %v1632_v51, 0.0  ;;  %v4603_v35 = vld [vmem:[#allocation38_spill] sm:$0xff] }
 0x1bd   : > { %v1695_v12 = vmax.f32 %v1631_v14, 0.0  ;;  %v1573_v39 = vmul.f32 0.125, %v4602_v36  ;;  %v1574_v10 = vmul.f32 0.125, %v4603_v35  ;;  %v1635_v28 = vadd.f32 3.0, %v1571_v11  ;;  %v4606_v14 = vld [vmem:[#allocation44_spill] sm:$0xff] }
 0x1be   : > { %v1636_v29 = vadd.f32 3.0, %v1572_v8  ;;  %v1884_v41 = vmul.f32 0.16666667, %v1820_v45  ;;  %v1883_v62 = vmul.f32 0.16666667, %v1819_v1  ;;  %v1698_v31 = vmax.f32 %v1634_v2, 0.0 }
 0x1bf   : > { %v1697_v55 = vmax.f32 %v1633_v59, 0.0  ;;  %v1822_v61 = vmul.f32 %v1758_v44, %v4595_v58  ;;  %v1821_v47 = vmul.f32 %v1757_v40, %v4594_v27  ;;  %v1760_v18 = vmin.f32 %v1696_v23, 6.0  ;;  %v4608_v59 = vld [vmem:[#allocation39_spill] sm:$0xff] }
 0x1c0   : > { %2037 = vrot.lane.b32.xlu1 %v1878_v26, %s2530_s24  ;;  %2035 = vrot.lane.b32.xlu0 %v1877_v34, %s2530_s24  ;;  %v1759_v48 = vmin.f32 %v1695_v12, 6.0  ;;  %v1637_v7 = vadd.f32 3.0, %v1573_v39  ;;  %v1638_v50 = vadd.f32 3.0, %v1574_v10  ;;  %v1575_v16 = vmul.f32 0.125, %v4604_v54 }
 0x1c1   : > { %v1576_v63 = vmul.f32 0.125, %v4605_v43  ;;  %v1762_v26 = vmin.f32 %v1698_v31, 6.0  ;;  %v1761_v34 = vmin.f32 %v1697_v55, 6.0  ;;  %v1700_v37 = vmax.f32 %v1636_v29, 0.0 }
 0x1c2   : > { %v1699_v33 = vmax.f32 %v1635_v28, 0.0  ;;  %v1886_v46 = vmul.f32 0.16666667, %v1822_v61  ;;  %v1885_v58 = vmul.f32 0.16666667, %v1821_v47  ;;  %v1824_v27 = vmul.f32 %v1760_v18, %v4597_v60  ;;  %v4610_v28 = vld [vmem:[#allocation41_spill] sm:$0xff] }
 0x1c3   : > { %v1823_v6 = vmul.f32 %v1759_v48, %v4596_v56  ;;  %v1577_v51 = vmul.f32 0.125, %v4606_v14  ;;  %v1578_v9 = vmul.f32 0.125, %v4607_v42  ;;  %v1639_v13 = vadd.f32 3.0, %v1575_v16 }
 0x1c4   : > { %2041 = vrot.lane.b32.xlu1 %v1880_v38, %s2530_s24  ;;  %2039 = vrot.lane.b32.xlu0 %v1879_v5, %s2530_s24  ;;  %v1640_v15 = vadd.f32 3.0, %v1576_v63  ;;  %v1826_v38 = vmul.f32 %v1762_v26, %v4599_v52  ;;  %v1825_v5 = vmul.f32 %v1761_v34, %v4598_v3  ;;  %v1764_v57 = vmin.f32 %v1700_v37, 6.0 }
 0x1c5   : > { %v1763_v17 = vmin.f32 %v1699_v33, 6.0  ;;  %v1888_v11 = vmul.f32 0.16666667, %v1824_v27  ;;  %v1887_v60 = vmul.f32 0.16666667, %v1823_v6  ;;  %v1702_v8 = vmax.f32 %v1638_v50, 0.0 }
 0x1c6   : > { %v1701_v56 = vmax.f32 %v1637_v7, 0.0  ;;  %v1579_v2 = vmul.f32 0.125, %v4608_v59  ;;  %v1641_v45 = vadd.f32 3.0, %v1577_v51  ;;  %v1642_v1 = vadd.f32 3.0, %v1578_v9 }
 0x1c7   : > { %v1890_v44 = vmul.f32 0.16666667, %v1826_v38  ;;  %v1889_v52 = vmul.f32 0.16666667, %v1825_v5  ;;  %v1828_v3 = vmul.f32 %v1764_v57, %v4601_v4  ;;  %v1827_v40 = vmul.f32 %v1763_v17, %v4600_v22 }
 0x1c8   : > { %2045 = vrot.lane.b32.xlu1 %v1882_v20, %s2530_s24  ;;  %2043 = vrot.lane.b32.xlu0 %v1881_v0, %s2530_s24  ;;  %v4609_v20 = vld [vmem:[#allocation40_spill] sm:$0xff]  ;;  %v1766_v23 = vmin.f32 %v1702_v8, 6.0  ;;  %v1765_v12 = vmin.f32 %v1701_v56, 6.0  ;;  %v1704_v39 = vmax.f32 %v1640_v15, 0.0  ;;  %v1703_v10 = vmax.f32 %v1639_v13, 0.0 }
 0x1c9   : > { %v1580_v0 = vmul.f32 0.125, %v4609_v20  ;;  %v1581_v29 = vmul.f32 0.125, %v4610_v28  ;;  %v1643_v31 = vadd.f32 3.0, %v1579_v2  ;;  %v1892_v61 = vmul.f32 0.16666667, %v1828_v3 }
 0x1ca   : > { %v1891_v47 = vmul.f32 0.16666667, %v1827_v40  ;;  %v1706_v18 = vmax.f32 %v1642_v1, 0.0  ;;  %v1705_v4 = vmax.f32 %v1641_v45, 0.0  ;;  %v1830_v22 = vmul.f32 %v1766_v23, %v4603_v35 }
 0x1cb   : > { %v1644_v55 = vadd.f32 3.0, %v1580_v0  ;;  %v1829_v48 = vmul.f32 %v1765_v12, %v4602_v36  ;;  %v1768_v7 = vmin.f32 %v1704_v39, 6.0  ;;  %v1767_v50 = vmin.f32 %v1703_v10, 6.0 }
 0x1cc   : > { %2049 = vrot.lane.b32.xlu1 %v1884_v41, %s2530_s24  ;;  %2047 = vrot.lane.b32.xlu0 %v1883_v62, %s2530_s24  ;;  %v4611_v41 = vld [vmem:[#allocation42_spill] sm:$0xff]  ;;  %v1645_v16 = vadd.f32 3.0, %v1581_v29  ;;  %v1583_v26 = vmul.f32 0.125, %v3997_v21  ;;  %v1584_v34 = vmul.f32 0.125, %v4000_v53  ;;  %v1770_v37 = vmin.f32 %v1706_v18, 6.0 }
 0x1cd   : > { %v1582_v62 = vmul.f32 0.125, %v4611_v41  ;;  %v1769_v33 = vmin.f32 %v1705_v4, 6.0  ;;  %v1894_v27 = vmul.f32 0.16666667, %v1830_v22  ;;  %v1893_v35 = vmul.f32 0.16666667, %v1829_v48 }
 0x1ce   : > { %v1832_v36 = vmul.f32 %v1768_v7, %v4605_v43  ;;  %v1831_v6 = vmul.f32 %v1767_v50, %v4604_v54  ;;  %v1585_v51 = vmul.f32 0.125, %v4003_v30  ;;  %v1586_v9 = vmul.f32 0.125, %v4006_v19 }
 0x1cf   : > { %v1646_v63 = vadd.f32 3.0, %v1582_v62  ;;  %v1647_v13 = vadd.f32 3.0, %v1583_v26  ;;  %v1648_v15 = vadd.f32 3.0, %v1584_v34  ;;  %v1834_v38 = vmul.f32 %v1770_v37, %v4607_v42 }
 0x1d0   : > { %2053 = vrot.lane.b32.xlu1 %v1886_v46, %s2530_s24  ;;  %2051 = vrot.lane.b32.xlu0 %v1885_v58, %s2530_s24  ;;  %v1708_v46 = vmax.f32 %v1644_v55, 0.0  ;;  %v1707_v58 = vmax.f32 %v1643_v31, 0.0  ;;  %v1833_v5 = vmul.f32 %v1769_v33, %v4606_v14  ;;  %v1709_v56 = vmax.f32 %v1645_v16, 0.0 }
 0x1d1   : > { %v1710_v8 = vmax.f32 %v1646_v63, 0.0  ;;  %v1587_v2 = vmul.f32 0.125, %v3961_v24  ;;  %v1588_v0 = vmul.f32 0.125, %v3964_v32  ;;  %v1649_v45 = vadd.f32 3.0, %v1585_v51 }
 0x1d2   : > { %v1772_v43 = vmin.f32 %v1708_v46, 6.0  ;;  %v1771_v57 = vmin.f32 %v1707_v58, 6.0  ;;  %v1650_v42 = vadd.f32 3.0, %v1586_v9  ;;  %v1898_v14 = vmul.f32 0.16666667, %v1834_v38 }
 0x1d3   : > { %v1897_v1 = vmul.f32 0.16666667, %v1833_v5  ;;  %v1774_v3 = vmin.f32 %v1710_v8, 6.0  ;;  %v1773_v40 = vmin.f32 %v1709_v56, 6.0  ;;  %v1712_v23 = vmax.f32 %v1648_v15, 0.0 }
 0x1d4   : > { %2057 = vrot.lane.b32.xlu1 %v1888_v11, %s2530_s24  ;;  %2055 = vrot.lane.b32.xlu0 %v1887_v60, %s2530_s24  ;;  %v1896_v11 = vmul.f32 0.16666667, %v1832_v36  ;;  %v1895_v60 = vmul.f32 0.16666667, %v1831_v6  ;;  %v1711_v12 = vmax.f32 %v1647_v13, 0.0  ;;  %v1589_v39 = vmul.f32 0.125, %v3967_v25 }
 0x1d5   : > { %v1590_v10 = vmul.f32 0.125, %v3970_v49  ;;  %v1651_v29 = vadd.f32 3.0, %v1587_v2  ;;  %v1652_v62 = vadd.f32 3.0, %v1588_v0  ;;  %v1776_v18 = vmin.f32 %v1712_v23, 6.0 }
 0x1d6   : > { %v1775_v4 = vmin.f32 %v1711_v12, 6.0  ;;  %v1653_v22 = vadd.f32 3.0, %v1589_v39 }
 0x1d7   : > { %v1654_v48 = vadd.f32 3.0, %v1590_v10  ;;  %v1716_v26 = vmax.f32 %v1652_v62, 0.0  ;;  %v1840_v37 = vmul.f32 %v1776_v18, %v4000_v53 }
 0x1d8   : > { %2061 = vrot.lane.b32.xlu1 %v1890_v44, %s2530_s24  ;;  %2059 = vrot.lane.b32.xlu0 %v1889_v52, %s2530_s24  ;;  %v1836_v44 = vmul.f32 %v1772_v43, %v4609_v20  ;;  %v1835_v52 = vmul.f32 %v1771_v57, %v4608_v59  ;;  %v1714_v20 = vmax.f32 %v1650_v42, 0.0  ;;  %v1713_v59 = vmax.f32 %v1649_v45, 0.0 }
 0x1d9   : > { %v1839_v33 = vmul.f32 %v1775_v4, %v3997_v21  ;;  %v1904_v36 = vmul.f32 0.16666667, %v1840_v37  ;;  %v1718_v51 = vmax.f32 %v1654_v48, 0.0  ;;  %v1717_v9 = vmax.f32 %v1653_v22, 0.0 }
 0x1da   : > { %v1900_v31 = vmul.f32 0.16666667, %v1836_v44  ;;  %v1899_v55 = vmul.f32 0.16666667, %v1835_v52  ;;  %v1778_v16 = vmin.f32 %v1714_v20, 6.0  ;;  %v1777_v63 = vmin.f32 %v1713_v59, 6.0 }
 0x1db   : > { %v1903_v6 = vmul.f32 0.16666667, %v1839_v33  ;;  %v1782_v38 = vmin.f32 %v1718_v51, 6.0  ;;  %v1781_v5 = vmin.f32 %v1717_v9, 6.0 }
 0x1dc   : > { %2065 = vrot.lane.b32.xlu1 %v1892_v61, %s2530_s24  ;;  %2063 = vrot.lane.b32.xlu0 %v1891_v47, %s2530_s24  ;;  %v1838_v61 = vmul.f32 %v1774_v3, %v4611_v41  ;;  %v1837_v47 = vmul.f32 %v1773_v40, %v4610_v28  ;;  %v1715_v41 = vmax.f32 %v1651_v29, 0.0  ;;  %v1842_v46 = vmul.f32 %v1778_v16, %v4006_v19 }
 0x1dd   : > { %v1841_v58 = vmul.f32 %v1777_v63, %v4003_v30  ;;  %v1845_v57 = vmul.f32 %v1781_v5, %v3967_v25 }
 0x1de   : > { %v1902_v34 = vmul.f32 0.16666667, %v1838_v61  ;;  %v1901_v28 = vmul.f32 0.16666667, %v1837_v47  ;;  %v1906_v13 = vmul.f32 0.16666667, %v1842_v46 }
 0x1df   : > { %v1905_v19 = vmul.f32 0.16666667, %v1841_v58 }
 0x1e0   : > { %2069 = vrot.lane.b32.xlu1 %v1894_v27, %s2530_s24  ;;  %2067 = vrot.lane.b32.xlu0 %v1893_v35, %s2530_s24  ;;  %v1780_v27 = vmin.f32 %v1716_v26, 6.0  ;;  %v1779_v35 = vmin.f32 %v1715_v41, 6.0 }
 0x1e1   : > { %v1978_v54 = vpop.permute.xlu1 %1977 }
 0x1e2   : > { %v1976_v17 = vpop.permute.xlu0 %1975  ;;  %2169 = vst.msk [vmem:[%s2925_s5 + $0x9] sm:$0xff] %vm2167_vm2, %v1978_v54  ;;  %v1844_v21 = vmul.f32 %v1780_v27, %v3964_v32  ;;  %v1843_v53 = vmul.f32 %v1779_v35, %v3961_v24  ;;  %v1846_v24 = vmul.f32 %v1782_v38, %v3970_v49 }
 0x1e3   : > { %2168 = vst.msk [vmem:[%s2925_s5 + $0x1] sm:$0xff] %vm2167_vm2, %v1976_v17  ;;  %v1909_v17 = vmul.f32 0.16666667, %v1845_v57 }
 0x1e4   : > { %2073 = vrot.lane.b32.xlu1 %v1896_v11, %s2530_s24  ;;  %2071 = vrot.lane.b32.xlu0 %v1895_v60, %s2530_s24  ;;  %v1908_v43 = vmul.f32 0.16666667, %v1844_v21  ;;  %v1907_v32 = vmul.f32 0.16666667, %v1843_v53  ;;  %v1910_v54 = vmul.f32 0.16666667, %v1846_v24 }
 0x1e8   : > { %2077 = vrot.lane.b32.xlu1 %v1898_v14, %s2530_s24  ;;  %2075 = vrot.lane.b32.xlu0 %v1897_v1, %s2530_s24 }
 0x1ec   : > { %2081 = vrot.lane.b32.xlu1 %v1900_v31, %s2530_s24  ;;  %2079 = vrot.lane.b32.xlu0 %v1899_v55, %s2530_s24  ;;  %v1982_v7 = vpop.permute.xlu1 %1981 }
 0x1ed   : > { %v1980_v50 = vpop.permute.xlu0 %1979  ;;  %2171 = vst.msk [vmem:[%s2925_s5 + $0x19] sm:$0xff] %vm2167_vm2, %v1982_v7 }
 0x1ee   : > { %2170 = vst.msk [vmem:[%s2925_s5 + $0x11] sm:$0xff] %vm2167_vm2, %v1980_v50 }
 0x1f0   : > { %2085 = vrot.lane.b32.xlu1 %v1902_v34, %s2530_s24  ;;  %2083 = vrot.lane.b32.xlu0 %v1901_v28, %s2530_s24 }
 0x1f4   : > { %2089 = vrot.lane.b32.xlu1 %v1904_v36, %s2530_s24  ;;  %2087 = vrot.lane.b32.xlu0 %v1903_v6, %s2530_s24 }
 0x1f6   : > { %v1986_v15 = vpop.permute.xlu1 %1985 }
 0x1f7   : > { %v1984_v30 = vpop.permute.xlu0 %1983  ;;  %2173 = vst.msk [vmem:[%s2925_s5 + $0x31] sm:$0xff] %vm2167_vm2, %v1986_v15 }
 0x1f8   : > { %2172 = vst.msk [vmem:[%s2925_s5 + $0x29] sm:$0xff] %vm2167_vm2, %v1984_v30  ;;  %2093 = vrot.lane.b32.xlu1 %v1906_v13, %s2530_s24  ;;  %2091 = vrot.lane.b32.xlu0 %v1905_v19, %s2530_s24 }
 0x1fc   : > { %2097 = vrot.lane.b32.xlu1 %v1908_v43, %s2530_s24  ;;  %2095 = vrot.lane.b32.xlu0 %v1907_v32, %s2530_s24 }
 0x200   : > { %2101 = vrot.lane.b32.xlu1 %v1910_v54, %s2530_s24  ;;  %2099 = vrot.lane.b32.xlu0 %v1909_v17, %s2530_s24 }
 0x201   : > { %v1990_v11 = vpop.permute.xlu1 %1989  ;;  %v1988_v49 = vpop.permute.xlu0 %1987 }
 0x202   : > { %2175 = vst.msk [vmem:[%s2925_s5 + $0x41] sm:$0xff] %vm2167_vm2, %v1990_v11  ;;  %2174 = vst.msk [vmem:[%s2925_s5 + $0x39] sm:$0xff] %vm2167_vm2, %v1988_v49 }
 0x205   : > { %v1994_v25 = vpop.permute.xlu1 %1993 }
 0x206   : > { %v1992_v60 = vpop.permute.xlu0 %1991  ;;  %2177 = vst.msk [vmem:[%s2925_s5 + $0x59] sm:$0xff] %vm2167_vm2, %v1994_v25 }
 0x207   : > { %2176 = vst.msk [vmem:[%s2925_s5 + $0x51] sm:$0xff] %vm2167_vm2, %v1992_v60 }
 0x20a   : > { %v1998_v8 = vpop.permute.xlu1 %1997  ;;  %v1996_v56 = vpop.permute.xlu0 %1995 }
 0x20b   : > { %2179 = vst.msk [vmem:[%s2925_s5 + $0x69] sm:$0xff] %vm2167_vm2, %v1998_v8  ;;  %2178 = vst.msk [vmem:[%s2925_s5 + $0x61] sm:$0xff] %vm2167_vm2, %v1996_v56 }
 0x20e   : > { %v2002_v2 = vpop.permute.xlu1 %2001  ;;  %v2000_v0 = vpop.permute.xlu0 %1999 }
 0x20f   : > { %2181 = vst.msk [vmem:[%s2925_s5 + $0x81] sm:$0xff] %vm2167_vm2, %v2002_v2  ;;  %2180 = vst.msk [vmem:[%s2925_s5 + $0x79] sm:$0xff] %vm2167_vm2, %v2000_v0 }
 0x212   : > { %v2006_v45 = vpop.permute.xlu1 %2005  ;;  %v2004_v42 = vpop.permute.xlu0 %2003 }
 0x213   : > { %2183 = vst.msk [vmem:[%s2925_s5 + $0x91] sm:$0xff] %vm2167_vm2, %v2006_v45  ;;  %2182 = vst.msk [vmem:[%s2925_s5 + $0x89] sm:$0xff] %vm2167_vm2, %v2004_v42 }
 0x216   : > { %v2010_v14 = vpop.permute.xlu1 %2009  ;;  %v2008_v1 = vpop.permute.xlu0 %2007 }
 0x217   : > { %2185 = vst.msk [vmem:[%s2925_s5 + $0xa9] sm:$0xff] %vm2167_vm2, %v2010_v14  ;;  %2184 = vst.msk [vmem:[%s2925_s5 + $0xa1] sm:$0xff] %vm2167_vm2, %v2008_v1 }
 0x21a   : > { %v2014_v44 = vpop.permute.xlu1 %2013  ;;  %v2012_v52 = vpop.permute.xlu0 %2011 }
 0x21b   : > { %2187 = vst.msk [vmem:[%s2925_s5 + $0xb9] sm:$0xff] %vm2167_vm2, %v2014_v44  ;;  %2186 = vst.msk [vmem:[%s2925_s5 + $0xb1] sm:$0xff] %vm2167_vm2, %v2012_v52 }
 0x21e   : > { %v2018_v3 = vpop.permute.xlu1 %2017  ;;  %v2016_v40 = vpop.permute.xlu0 %2015 }
 0x21f   : > { %2189 = vst.msk [vmem:[%s2925_s5 + $0xd1] sm:$0xff] %vm2167_vm2, %v2018_v3  ;;  %2188 = vst.msk [vmem:[%s2925_s5 + $0xc9] sm:$0xff] %vm2167_vm2, %v2016_v40 }
 0x222   : > { %v2022_v23 = vpop.permute.xlu1 %2021  ;;  %v2020_v12 = vpop.permute.xlu0 %2019 }
 0x223   : > { %2191 = vst.msk [vmem:[%s2925_s5 + $0xe1] sm:$0xff] %vm2167_vm2, %v2022_v23  ;;  %2190 = vst.msk [vmem:[%s2925_s5 + $0xd9] sm:$0xff] %vm2167_vm2, %v2020_v12 }
 0x226   : > { %v2026_v39 = vpop.permute.xlu1 %2025  ;;  %v2024_v10 = vpop.permute.xlu0 %2023 }
 0x227   : > { %2193 = vst.msk [vmem:[%s2925_s5 + $0xf9] sm:$0xff] %vm2167_vm2, %v2026_v39  ;;  %2192 = vst.msk [vmem:[%s2925_s5 + $0xf1] sm:$0xff] %vm2167_vm2, %v2024_v10 }
 0x22a   : > { %v2030_v29 = vpop.permute.xlu1 %2029  ;;  %v2028_v62 = vpop.permute.xlu0 %2027 }
 0x22b   : > { %2195 = vst.msk [vmem:[%s2925_s5 + $0x109] sm:$0xff] %vm2167_vm2, %v2030_v29  ;;  %2194 = vst.msk [vmem:[%s2925_s5 + $0x101] sm:$0xff] %vm2167_vm2, %v2028_v62 }
 0x22e   : > { %v2034_v31 = vpop.permute.xlu1 %2033  ;;  %v2032_v55 = vpop.permute.xlu0 %2031 }
 0x22f   : > { %2197 = vst.msk [vmem:[%s2925_s5 + $0x121] sm:$0xff] %vm2167_vm2, %v2034_v31  ;;  %2196 = vst.msk [vmem:[%s2925_s5 + $0x119] sm:$0xff] %vm2167_vm2, %v2032_v55 }
 0x232   : > { %v2038_v20 = vpop.permute.xlu1 %2037  ;;  %v2036_v59 = vpop.permute.xlu0 %2035 }
 0x233   : > { %2199 = vst.msk [vmem:[%s2925_s5 + $0x131] sm:$0xff] %vm2167_vm2, %v2038_v20  ;;  %2198 = vst.msk [vmem:[%s2925_s5 + $0x129] sm:$0xff] %vm2167_vm2, %v2036_v59 }
 0x236   : > { %v2042_v61 = vpop.permute.xlu1 %2041  ;;  %v2040_v47 = vpop.permute.xlu0 %2039 }
 0x237   : > { %2201 = vst.msk [vmem:[%s2925_s5 + $0x149] sm:$0xff] %vm2167_vm2, %v2042_v61  ;;  %2200 = vst.msk [vmem:[%s2925_s5 + $0x141] sm:$0xff] %vm2167_vm2, %v2040_v47 }
 0x23a   : > { %v2046_v18 = vpop.permute.xlu1 %2045  ;;  %v2044_v4 = vpop.permute.xlu0 %2043 }
 0x23b   : > { %2203 = vst.msk [vmem:[%s2925_s5 + $0x159] sm:$0xff] %vm2167_vm2, %v2046_v18  ;;  %2202 = vst.msk [vmem:[%s2925_s5 + $0x151] sm:$0xff] %vm2167_vm2, %v2044_v4 }
 0x23e   : > { %v2050_v22 = vpop.permute.xlu1 %2049  ;;  %v2048_v48 = vpop.permute.xlu0 %2047 }
 0x23f   : > { %2205 = vst.msk [vmem:[%s2925_s5 + $0x171] sm:$0xff] %vm2167_vm2, %v2050_v22  ;;  %2204 = vst.msk [vmem:[%s2925_s5 + $0x169] sm:$0xff] %vm2167_vm2, %v2048_v48 }
 0x242   : > { %v2054_v7 = vpop.permute.xlu1 %2053  ;;  %v2052_v50 = vpop.permute.xlu0 %2051 }
 0x243   : > { %2207 = vst.msk [vmem:[%s2925_s5 + $0x181] sm:$0xff] %vm2167_vm2, %v2054_v7  ;;  %2206 = vst.msk [vmem:[%s2925_s5 + $0x179] sm:$0xff] %vm2167_vm2, %v2052_v50 }
 0x246   : > { %v2058_v16 = vpop.permute.xlu1 %2057  ;;  %v2056_v63 = vpop.permute.xlu0 %2055 }
 0x247   : > { %2209 = vst.msk [vmem:[%s2925_s5 + $0x199] sm:$0xff] %vm2167_vm2, %v2058_v16  ;;  %2208 = vst.msk [vmem:[%s2925_s5 + $0x191] sm:$0xff] %vm2167_vm2, %v2056_v63 }
 0x24a   : > { %v2062_v26 = vpop.permute.xlu1 %2061  ;;  %v2060_v41 = vpop.permute.xlu0 %2059 }
 0x24b   : > { %2211 = vst.msk [vmem:[%s2925_s5 + $0x1a9] sm:$0xff] %vm2167_vm2, %v2062_v26  ;;  %2210 = vst.msk [vmem:[%s2925_s5 + $0x1a1] sm:$0xff] %vm2167_vm2, %v2060_v41 }
 0x24e   : > { %v2066_v34 = vpop.permute.xlu1 %2065  ;;  %v2064_v28 = vpop.permute.xlu0 %2063 }
 0x24f   : > { %2213 = vst.msk [vmem:[%s2925_s5 + $0x1c1] sm:$0xff] %vm2167_vm2, %v2066_v34  ;;  %2212 = vst.msk [vmem:[%s2925_s5 + $0x1b9] sm:$0xff] %vm2167_vm2, %v2064_v28 }
 0x252   : > { %v2070_v37 = vpop.permute.xlu1 %2069  ;;  %v2068_v33 = vpop.permute.xlu0 %2067 }
 0x253   : > { %2215 = vst.msk [vmem:[%s2925_s5 + $0x1d1] sm:$0xff] %vm2167_vm2, %v2070_v37  ;;  %2214 = vst.msk [vmem:[%s2925_s5 + $0x1c9] sm:$0xff] %vm2167_vm2, %v2068_v33 }
 0x256   : > { %v2074_v46 = vpop.permute.xlu1 %2073  ;;  %v2072_v58 = vpop.permute.xlu0 %2071 }
 0x257   : > { %2217 = vst.msk [vmem:[%s2925_s5 + $0x1e9] sm:$0xff] %vm2167_vm2, %v2074_v46  ;;  %2216 = vst.msk [vmem:[%s2925_s5 + $0x1e1] sm:$0xff] %vm2167_vm2, %v2072_v58 }
 0x25a   : > { %v2078_v27 = vpop.permute.xlu1 %2077  ;;  %v2076_v35 = vpop.permute.xlu0 %2075 }
 0x25b   : > { %2219 = vst.msk [vmem:[%s2925_s5 + $0x1f9] sm:$0xff] %vm2167_vm2, %v2078_v27  ;;  %2218 = vst.msk [vmem:[%s2925_s5 + $0x1f1] sm:$0xff] %vm2167_vm2, %v2076_v35 }
 0x25e   : > { %v2082_v36 = vpop.permute.xlu1 %2081  ;;  %v2080_v6 = vpop.permute.xlu0 %2079 }
 0x25f   : > { %2221 = vst.msk [vmem:[%s2925_s5 + $0x211] sm:$0xff] %vm2167_vm2, %v2082_v36  ;;  %2220 = vst.msk [vmem:[%s2925_s5 + $0x209] sm:$0xff] %vm2167_vm2, %v2080_v6 }
 0x262   : > { %v2086_v51 = vpop.permute.xlu1 %2085  ;;  %v2084_v9 = vpop.permute.xlu0 %2083 }
 0x263   : > { %2223 = vst.msk [vmem:[%s2925_s5 + $0x221] sm:$0xff] %vm2167_vm2, %v2086_v51  ;;  %2222 = vst.msk [vmem:[%s2925_s5 + $0x219] sm:$0xff] %vm2167_vm2, %v2084_v9 }
 0x266   : > { %v2090_v21 = vpop.permute.xlu1 %2089  ;;  %v2088_v53 = vpop.permute.xlu0 %2087 }
 0x267   : > { %2225 = vst.msk [vmem:[%s2925_s5 + $0x239] sm:$0xff] %vm2167_vm2, %v2090_v21  ;;  %2224 = vst.msk [vmem:[%s2925_s5 + $0x231] sm:$0xff] %vm2167_vm2, %v2088_v53 }
 0x26a   : > { %v2094_v13 = vpop.permute.xlu1 %2093  ;;  %v2092_v19 = vpop.permute.xlu0 %2091 }
 0x26b   : > { %2227 = vst.msk [vmem:[%s2925_s5 + $0x249] sm:$0xff] %vm2167_vm2, %v2094_v13  ;;  %2226 = vst.msk [vmem:[%s2925_s5 + $0x241] sm:$0xff] %vm2167_vm2, %v2092_v19 }
 0x26e   : > { %v2098_v15 = vpop.permute.xlu1 %2097  ;;  %v2096_v30 = vpop.permute.xlu0 %2095 }
 0x26f   : > { %2229 = vst.msk [vmem:[%s2925_s5 + $0x261] sm:$0xff] %vm2167_vm2, %v2098_v15  ;;  %2228 = vst.msk [vmem:[%s2925_s5 + $0x259] sm:$0xff] %vm2167_vm2, %v2096_v30 }
 0x272   : > { %v2102_v38 = vpop.permute.xlu1 %2101  ;;  %v2100_v5 = vpop.permute.xlu0 %2099 }
 0x273   : > { %2231 = vst.msk [vmem:[%s2925_s5 + $0x271] sm:$0xff] %vm2167_vm2, %v2102_v38  ;;  %2230 = vst.msk [vmem:[%s2925_s5 + $0x269] sm:$0xff] %vm2167_vm2, %v2100_v5 }
 0x274 PF: > { %p12_p8 = scmp.ge.s32.totalorder %s2568_s14, 4   ;;  %s4612_s9 = smov %s2516_s10 }
 0x275   : > { %s4613_s10 = smov %s2520_s11  ;;  %s4614_s11 = smov %s2578_s17 }
 0x276   : > { %s4615_s12 = smov %s2568_s14  ;;  %14 = sbr.rel (!%p12_p8) target bundleno = 3 (0x3), region = 73 }
 0x27d   :  { %2253 = vsyncpa [#allocation3], 1 }
 0x27e   :  { %2255 = vsyncpa [#allocation3 + $0x1], 1 }

</bundles_post_ra>
